<compile_context>
chip_gen: v7x
topology: tpu7x:2x2x1
jax: 0.10.0
libtpu: 0.0.40
codegen_flags: <defaults>
</compile_context>

<pallas_src>
import functools
import math

import jax
import jax.numpy as jnp
from jax.experimental import pallas as pl
from jax.experimental.pallas import tpu as pltpu

_LANE_ALIGN = 256                      # fill the 2x256x256 MXU on v6e/v7x
_INV_SQRT2 = 0.7071067811865476


def _round_up(x, m):
    return (x + m - 1) // m * m


def _gelu_f32(h, approximate):
    if approximate:
        return jax.nn.gelu(h, approximate=True)           # tanh -> EUP
    return 0.5 * h * (1.0 + jax.lax.erf(h * _INV_SQRT2))  # exact, matches torch.nn.GELU()


def _vmem_capacity_bytes():
    try:
        return int(pltpu.get_tpu_info().vmem_capacity_bytes)
    except Exception:
        return 64 * 1024 * 1024        # conservative fallback (v7x per-TensorCore VMEM)


# ----------------------------------------------------------------------------- kernels
def _ffn_resident_kernel(x_ref, w1_ref, b1_ref, w2_ref, b2_ref, o_ref, *, approximate_gelu):
    """Weights fully VMEM-resident; grid = (token tiles,). No accumulator scratch needed."""
    h = jnp.dot(x_ref[...], w1_ref[...], preferred_element_type=jnp.float32)
    h = h + b1_ref[...]
    h = _gelu_f32(h, approximate_gelu)
    # dropout1: identity (eval mode)
    h = h.astype(w2_ref.dtype)         # back to storage dtype -> native MXU rate
    out = jnp.dot(h, w2_ref[...], preferred_element_type=jnp.float32) + b2_ref[...]
    # dropout2: identity (eval mode)
    o_ref[...] = out.astype(o_ref.dtype)


def _ffn_tiled_kernel(x_ref, w1_ref, b1_ref, w2_ref, b2_ref, o_ref, acc_ref, *, approximate_gelu):
    """F-tiled: grid = (token tiles, F tiles); linear2 partial sums accumulate in f32 VMEM."""
    f = pl.program_id(1)

    @pl.when(f == 0)
    def _init():
        acc_ref[...] = jnp.zeros_like(acc_ref)

    # linear1 (this F-slice of columns), f32 accumulation
    h = jnp.dot(x_ref[...], w1_ref[...], preferred_element_type=jnp.float32)
    h = h + b1_ref[...]
    h = _gelu_f32(h, approximate_gelu)
    # dropout1: identity (eval mode)
    h = h.astype(w2_ref.dtype)
    # linear2 partial sum over the F axis
    acc_ref[...] += jnp.dot(h, w2_ref[...], preferred_element_type=jnp.float32)

    @pl.when(f == pl.num_programs(1) - 1)
    def _finalize():
        out = acc_ref[...] + b2_ref[...]
        # dropout2: identity (eval mode)
        o_ref[...] = out.astype(o_ref.dtype)


# ----------------------------------------------------------------------------- params / config
def prepare_params(w1, b1, w2, b2, *, compute_dtype=None):
    """One-time pad to 256-multiples + cast the weights to the MXU compute dtype.

    w1: (E, F)  b1: (F,)  w2: (F, E)  b2: (E,)   -- (in, out) layout so kernels do x @ W.
    Hoisted out of the per-call path so weight padding/casting is not re-done every forward.
    """
    E, F = w1.shape
    assert w2.shape == (F, E) and b1.shape == (F,) and b2.shape == (E,)
    cdt = jnp.dtype(compute_dtype) if compute_dtype is not None else jnp.dtype(w1.dtype)
    Ep = _round_up(E, _LANE_ALIGN)
    Fp = _round_up(F, _LANE_ALIGN)
    return {
        "w1": jnp.pad(w1, ((0, Ep - E), (0, Fp - F))).astype(cdt),
        "b1": jnp.pad(b1, (0, Fp - F)).reshape(1, Fp).astype(jnp.float32),
        "w2": jnp.pad(w2, ((0, Fp - F), (0, Ep - E))).astype(cdt),
        "b2": jnp.pad(b2, (0, Ep - E)).reshape(1, Ep).astype(jnp.float32),
        "E": E, "F": F, "Ep": Ep, "Fp": Fp, "compute_dtype": cdt,
    }


def _select_config(M, Ep, Fp, cbytes, weight_resident):
    """Per-generation tile sizes / mode, derived from the actual VMEM capacity."""
    vmem = _vmem_capacity_bytes()
    big_vmem = vmem >= 96 * 1024 * 1024            # v5e/v6e: 128 MiB;  v7x: 64 MiB
    vmem_limit = int(vmem * 0.85)                  # ~108 MiB on v5e/v6e, ~54 MiB on v7x

    weight_bytes = 2 * Ep * Fp * cbytes + 4 * (Ep + Fp)

    # ---- weight-resident candidate: modest tm (intensity vs HBM is already huge,
    #      since weights stream exactly once); keeps the (tm, Fp) intermediate small.
    tm_res = 256
    resident_need = (weight_bytes
                     + 2 * 2 * tm_res * Ep * cbytes           # double-buffered x / out tiles
                     + tm_res * Fp * (4 + cbytes))            # f32 hidden + cast copy
    resident_ok = resident_need <= (0.70 if big_vmem else 0.55) * vmem
    if weight_resident is None:
        weight_resident = resident_ok
    elif weight_resident and not resident_ok:
        weight_resident = False                               # would not fit -> fall back

    if weight_resident:
        return dict(mode="resident", tm=tm_res, tf=Fp, vmem_limit=vmem_limit)

    # ---- F-tiled fallback: large token tile to amortize per-token-tile weight re-streaming
    tm = 1024 if big_vmem else 512
    tf = 512 if big_vmem else 256
    tm = min(tm, max(256, _round_up(M, 256)))
    while Fp % tf:                                            # tf must divide padded F
        tf //= 2
    if not big_vmem:
        # v7x: keep >= 2 token tiles so the "parallel" axis feeds both TensorCores
        while tm > 256 and _round_up(M, tm) // tm < 2:
            tm //= 2

    def est(tm_, tf_):
        return (2 * 2 * tm_ * Ep * cbytes                     # x / out, double-buffered
                + 2 * 3 * Ep * tf_ * cbytes                   # W1 + W2, Buffered(3)
                + tm_ * Ep * 4                                # f32 accumulator scratch
                + tm_ * tf_ * (4 + cbytes))                   # f32 hidden + cast copy

    while est(tm, tf) > 0.8 * vmem_limit and (tm > 256 or tf > 256):
        if tm > 256:
            tm //= 2
        else:
            tf //= 2
    return dict(mode="tiled", tm=tm, tf=tf, vmem_limit=vmem_limit)


# ----------------------------------------------------------------------------- forward
def feed_forward(x, params, *, approximate_gelu=False, weight_resident=None, tm=None, tf=None):
    """x: (B, S, E) -> (B, S, E). `params` comes from prepare_params()."""
    B, S, E = x.shape
    assert E == params["E"]
    Ep, Fp = params["Ep"], params["Fp"]
    cdt = params["compute_dtype"]
    out_dtype = x.dtype
    M = B * S

    cfg = _select_config(M, Ep, Fp, jnp.dtype(cdt).itemsize, weight_resident)
    tm = int(tm) if tm is not None else cfg["tm"]
    tf = int(tf) if tf is not None else cfg["tf"]
    while Fp % tf:
        tf //= 2
    Mp = _round_up(M, tm)

    # per-call work on activations only (weights were padded/cast once in prepare_params)
    xp = jnp.pad(x.reshape(M, E), ((0, Mp - M), (0, Ep - E))).astype(cdt)
    w1, b1, w2, b2 = params["w1"], params["b1"], params["w2"], params["b2"]

    if cfg["mode"] == "resident" and tf == Fp:
        kernel = functools.partial(_ffn_resident_kernel, approximate_gelu=approximate_gelu)
        out2d = pl.pallas_call(
            kernel,
            out_shape=jax.ShapeDtypeStruct((Mp, Ep), out_dtype),
            grid=(Mp // tm,),
            in_specs=[
                pl.BlockSpec((tm, Ep), lambda i: (i, 0)),   # x token tile
                pl.BlockSpec((Ep, Fp), lambda i: (0, 0)),   # W1 (constant -> DMA'd once, VMEM-resident)
                pl.BlockSpec((1, Fp), lambda i: (0, 0)),    # b1
                pl.BlockSpec((Fp, Ep), lambda i: (0, 0)),   # W2 (constant -> DMA'd once, VMEM-resident)
                pl.BlockSpec((1, Ep), lambda i: (0, 0)),    # b2
            ],
            out_specs=pl.BlockSpec((tm, Ep), lambda i: (i, 0)),
            compiler_params=pltpu.CompilerParams(
                dimension_semantics=("parallel",),
                vmem_limit_bytes=cfg["vmem_limit"],
            ),
        )(xp, w1, b1, w2, b2)
    else:
        n_f = Fp // tf
        kernel = functools.partial(_ffn_tiled_kernel, approximate_gelu=approximate_gelu)
        if n_f >= 2:
            # deepen pipelining only on the blocks that actually change with f
            w1_spec = pl.BlockSpec((Ep, tf), lambda i, f: (0, f), pipeline_mode=pl.Buffered(3))
            w2_spec = pl.BlockSpec((tf, Ep), lambda i, f: (f, 0), pipeline_mode=pl.Buffered(3))
        else:
            w1_spec = pl.BlockSpec((Ep, tf), lambda i, f: (0, f))
            w2_spec = pl.BlockSpec((tf, Ep), lambda i, f: (f, 0))
        out2d = pl.pallas_call(
            kernel,
            out_shape=jax.ShapeDtypeStruct((Mp, Ep), out_dtype),
            grid=(Mp // tm, n_f),
            in_specs=[
                pl.BlockSpec((tm, Ep), lambda i, f: (i, 0)),   # x tile (constant across f)
                w1_spec,                                       # W1 F-slice
                pl.BlockSpec((1, tf), lambda i, f: (0, f)),    # b1 F-slice
                w2_spec,                                       # W2 F-slice
                pl.BlockSpec((1, Ep), lambda i, f: (0, 0)),    # b2 (finalize only)
            ],
            out_specs=pl.BlockSpec((tm, Ep), lambda i, f: (i, 0)),
            scratch_shapes=[pltpu.VMEM((tm, Ep), jnp.float32)],
            compiler_params=pltpu.CompilerParams(
                dimension_semantics=("parallel", "arbitrary"),
                vmem_limit_bytes=cfg["vmem_limit"],
            ),
        )(xp, w1, b1, w2, b2)

    return out2d[:M, :E].reshape(B, S, E)


def init_params(key, embed_dim, ffn_dim, dtype=jnp.float32):
    """Deterministic init mimicking nn.Linear's U(-1/sqrt(fan_in), 1/sqrt(fan_in))."""
    k1, k2, k3, k4 = jax.random.split(key, 4)
    bound1 = 1.0 / math.sqrt(embed_dim)
    bound2 = 1.0 / math.sqrt(ffn_dim)
    # stored as (in, out) so the kernel does x @ W directly
    w1 = jax.random.uniform(k1, (embed_dim, ffn_dim), dtype, -bound1, bound1)
    b1 = jax.random.uniform(k2, (ffn_dim,), dtype, -bound1, bound1)
    w2 = jax.random.uniform(k3, (ffn_dim, embed_dim), dtype, -bound2, bound2)
    b2 = jax.random.uniform(k4, (embed_dim,), dtype, -bound2, bound2)
    return w1, b1, w2, b2


if __name__ == "__main__":
    batch, seq, embed_dim, ffn_dim = 2, 8, 32, 64

    key = jax.random.PRNGKey(0)
    kx, kp = jax.random.split(key)
    x = jax.random.normal(kx, (batch, seq, embed_dim), jnp.float32)
    w1, b1, w2, b2 = init_params(kp, embed_dim, ffn_dim)

    def reference(xr, w1r, b1r, w2r, b2r):
        h = xr @ w1r + b1r
        h = 0.5 * h * (1.0 + jax.lax.erf(h / jnp.sqrt(2.0)))
        return h @ w2r + b2r      # dropout is identity in eval mode

    ref = reference(x, w1, b1, w2, b2)

    # 1) default config: weight-resident fast path at these sizes, f32 compute
    params_f32 = prepare_params(w1, b1, w2, b2)
    out = feed_forward(x, params_f32)
    jax.block_until_ready(out)
    assert out.shape == (batch, seq, embed_dim)
    assert jnp.allclose(out, ref, atol=1e-5, rtol=1e-5)

    # 2) forced F-tiled path (accumulator + pl.when init/finalize), f32 compute
    out_tiled = feed_forward(x, params_f32, weight_resident=False)
    jax.block_until_ready(out_tiled)
    assert jnp.allclose(out_tiled, ref, atol=1e-5, rtol=1e-5)

    # 3) F-tiled path with multiple F steps (exercises Buffered(3) weight pipelining)
    ffn_big = 768
    w1b, b1b, w2b, b2b = init_params(jax.random.PRNGKey(1), embed_dim, ffn_big)
    params_big = prepare_params(w1b, b1b, w2b, b2b)
    out_big = feed_forward(x, params_big, weight_resident=False, tm=256, tf=256)
    jax.block_until_ready(out_big)
    ref_big = reference(x, w1b, b1b, w2b, b2b)
    assert jnp.allclose(out_big, ref_big, atol=1e-5, rtol=1e-5)

    # 4) bf16 MXU feed (f32 params cast once in prepare_params), f32 accumulation
    params_bf16 = prepare_params(w1, b1, w2, b2, compute_dtype=jnp.bfloat16)
    out_bf16 = feed_forward(x, params_bf16)
    jax.block_until_ready(out_bf16)
    assert jnp.allclose(out_bf16, ref, atol=2e-2, rtol=2e-2)

    print("KERNEL_OK")
</pallas_src>

<mosaic_0001>
module attributes {stable_mosaic.version = 11 : i64} {
  func.func @_ffn_resident_kernel(%arg0: i32, %arg1: memref<256x256xf32, #tpu.memory_space<vmem>>, %arg2: memref<256x256xf32, #tpu.memory_space<vmem>>, %arg3: memref<1x256xf32, #tpu.memory_space<vmem>>, %arg4: memref<256x256xf32, #tpu.memory_space<vmem>>, %arg5: memref<1x256xf32, #tpu.memory_space<vmem>>, %arg6: memref<256x256xf32, #tpu.memory_space<vmem>>) attributes {dimension_semantics = [#tpu.dimension_semantics<parallel>], iteration_bounds = array<i64: 1>, scalar_prefetch = 0 : i64, scratch_operands = 0 : i64, tpu.core_type = #tpu.core_type<tc>, window_params = [{transform_indices = @transform_0, window_bounds = array<i64: 256, 256>}, {pipeline_mode = #tpu.pipeline_mode<synchronous>, transform_indices = @transform_1, window_bounds = array<i64: 256, 256>}, {pipeline_mode = #tpu.pipeline_mode<synchronous>, transform_indices = @transform_2, window_bounds = array<i64: 1, 256>}, {pipeline_mode = #tpu.pipeline_mode<synchronous>, transform_indices = @transform_3, window_bounds = array<i64: 256, 256>}, {pipeline_mode = #tpu.pipeline_mode<synchronous>, transform_indices = @transform_4, window_bounds = array<i64: 1, 256>}, {transform_indices = @transform_5, window_bounds = array<i64: 256, 256>}]} {
    %c0 = arith.constant 0 : index
    %c0_0 = arith.constant 0 : index
    %0 = vector.load %arg1[%c0, %c0_0] : memref<256x256xf32, #tpu.memory_space<vmem>>, vector<256x256xf32>
    %c0_1 = arith.constant 0 : index
    %c0_2 = arith.constant 0 : index
    %1 = vector.load %arg2[%c0_1, %c0_2] : memref<256x256xf32, #tpu.memory_space<vmem>>, vector<256x256xf32>
    %cst = arith.constant dense<0.000000e+00> : vector<256x256xf32>
    %2 = tpu.matmul %0, %1, %cst {dimension_numbers = #tpu.dot_dimension_numbers<[1], [0], [0], [1], [0, 0, 1, 1], [], []>} : vector<256x256xf32>, vector<256x256xf32>, vector<256x256xf32> -> vector<256x256xf32>
    %c0_3 = arith.constant 0 : index
    %c0_4 = arith.constant 0 : index
    %3 = vector.load %arg3[%c0_3, %c0_4] : memref<1x256xf32, #tpu.memory_space<vmem>>, vector<1x256xf32>
    %4 = vector.broadcast %3 : vector<1x256xf32> to vector<256x256xf32>
    %5 = arith.addf %2, %4 : vector<256x256xf32>
    %cst_5 = arith.constant 5.000000e-01 : f32
    %6 = vector.broadcast %cst_5 : f32 to vector<256x256xf32>
    %7 = arith.mulf %6, %5 : vector<256x256xf32>
    %cst_6 = arith.constant 0.707106769 : f32
    %8 = vector.broadcast %cst_6 : f32 to vector<256x256xf32>
    %9 = arith.mulf %5, %8 : vector<256x256xf32>
    %10 = math.erf %9 : vector<256x256xf32>
    %cst_7 = arith.constant 1.000000e+00 : f32
    %11 = vector.broadcast %cst_7 : f32 to vector<256x256xf32>
    %12 = arith.addf %11, %10 : vector<256x256xf32>
    %13 = arith.mulf %7, %12 : vector<256x256xf32>
    %c0_8 = arith.constant 0 : index
    %c0_9 = arith.constant 0 : index
    %14 = vector.load %arg4[%c0_8, %c0_9] : memref<256x256xf32, #tpu.memory_space<vmem>>, vector<256x256xf32>
    %cst_10 = arith.constant dense<0.000000e+00> : vector<256x256xf32>
    %15 = tpu.matmul %13, %14, %cst_10 {dimension_numbers = #tpu.dot_dimension_numbers<[1], [0], [0], [1], [0, 0, 1, 1], [], []>} : vector<256x256xf32>, vector<256x256xf32>, vector<256x256xf32> -> vector<256x256xf32>
    %c0_11 = arith.constant 0 : index
    %c0_12 = arith.constant 0 : index
    %16 = vector.load %arg5[%c0_11, %c0_12] : memref<1x256xf32, #tpu.memory_space<vmem>>, vector<1x256xf32>
    %17 = vector.broadcast %16 : vector<1x256xf32> to vector<256x256xf32>
    %18 = arith.addf %15, %17 : vector<256x256xf32>
    %c0_13 = arith.constant 0 : index
    %c0_14 = arith.constant 0 : index
    %19 = vector.load %arg6[%c0_13, %c0_14] : memref<256x256xf32, #tpu.memory_space<vmem>>, vector<256x256xf32>
    tpu.vector_store %arg6[%c0_13, %c0_14], %18 {strides = array<i32>} : memref<256x256xf32, #tpu.memory_space<vmem>>, vector<256x256xf32>,
    return
  }
  func.func @transform_0(%arg0: i32) -> (i32, i32) {
    %c0_i32 = arith.constant 0 : i32
    %c0_i32_0 = arith.constant 0 : i32
    return %arg0, %c0_i32 : i32, i32
  }
  func.func @transform_1(%arg0: i32) -> (i32, i32) {
    %c0_i32 = arith.constant 0 : i32
    %c0_i32_0 = arith.constant 0 : i32
    %c0_i32_1 = arith.constant 0 : i32
    return %c0_i32, %c0_i32_0 : i32, i32
  }
  func.func @transform_2(%arg0: i32) -> (i32, i32) {
    %c0_i32 = arith.constant 0 : i32
    %c0_i32_0 = arith.constant 0 : i32
    %c0_i32_1 = arith.constant 0 : i32
    return %c0_i32, %c0_i32_0 : i32, i32
  }
  func.func @transform_3(%arg0: i32) -> (i32, i32) {
    %c0_i32 = arith.constant 0 : i32
    %c0_i32_0 = arith.constant 0 : i32
    %c0_i32_1 = arith.constant 0 : i32
    return %c0_i32, %c0_i32_0 : i32, i32
  }
  func.func @transform_4(%arg0: i32) -> (i32, i32) {
    %c0_i32 = arith.constant 0 : i32
    %c0_i32_0 = arith.constant 0 : i32
    %c0_i32_1 = arith.constant 0 : i32
    return %c0_i32, %c0_i32_0 : i32, i32
  }
  func.func @transform_5(%arg0: i32) -> (i32, i32) {
    %c0_i32 = arith.constant 0 : i32
    %c0_i32_0 = arith.constant 0 : i32
    return %arg0, %c0_i32 : i32, i32
  }
}

</mosaic_0001>

<bundles_post_ra>
// kernel: tpu_custom_call.1
= control target key start
LH: loop header
LB: loop body
LE: loop exit
PB: predicated region body
PF: predicated region fallthrough
CT: control target
= control target key end

     0   :  { %10 = vsyncpa [#allocation3], 0  ;;  %s2015_s0 = inlined_call_operand.hbm [shape: f32[256,256], index: 0, kind: input, shape index: {}]   ;;  %s2016_s1 = inlined_call_operand.hbm [shape: f32[256,256], index: 1, kind: input, shape index: {}]   ;;  %s2017_s2 = inlined_call_operand.vmem [shape: f32[1,256], index: 2, kind: input, shape index: {}]   ;;  %s2018_s3 = inlined_call_operand.hbm [shape: f32[256,256], index: 3, kind: input, shape index: {}]   ;;  %s2019_s4 = inlined_call_operand.vmem [shape: f32[1,256], index: 4, kind: input, shape index: {}]   ;;  %s2020_s5 = inlined_call_operand.hbm [shape: f32[256,256], index: 5, kind: output, shape index: {}]  }
   0x1   :  { %11 = vsyncpa [#allocation6], 0 }
   0x2   :  { %12 = vsyncpa [#allocation4], 0  ;;  %s1550_s18 = smov [#allocation5]   ;;  %s1551_s20 = smov [#allocation2]  }
   0x3   :  { %s30_s19 = sshll.u32 %s1550_s18, 4  ;;  %s18_s21 = sshll.u32 %s1551_s20, 4  ;;  %s31_s19 = int_to_ptr.vmem [resolvable:$true] %s30_s19  ;;  %s1586_s21 = int_to_ptr.vmem [resolvable:$true] %s18_s21 }
   0x4   :  { %s1456_s24 = scalar_lea.hbm %s2016_s1, 8192 }
   0x5   :  { %p1457_p0 = scmp.ne.s32.totalorder %s2016_s1, %s1456_s24  ;;  %p1460_p1 = scmp.lt.u32.totalorder %s1456_s24, %s2016_s1 }
   0x7   :  { %p1462_p2 = pnand %p1460_p1, %p1457_p0 }
   0x9   :  { %1465 = shalt.err (!%p1462_p2)
}
   0xa   :  { %s1466_s29 = scalar_lea.vmem %s31_s19, 8192  ;;  %p1471_p4 = scmp.lt.s32.totalorder %s31_s19, %s31_s19 }
   0xb   :  { %p1467_p3 = scmp.ne.s32.totalorder %s31_s19, %s1466_s29  ;;  %p1472_p5 = scmp.lt.s32.totalorder %s1466_s29, %s1466_s29 }
   0xd   :  { %p1473_p6 = por %p1472_p5, %p1471_p4 }
   0xf   :  { %p1474_p7 = pnand %p1473_p6, %p1467_p3 }
  0x11   :  { %1477 = shalt.err (!%p1474_p7)
}
  0x12   :  { %s1552_s30 = smov 256   ;;  %s1553_s6 = smov 16  }
  0x13   :  { %36 = dma.hbm_to_vmem [thread:$0]  %s2016_s1, 8192, %s31_s19, [#allocation6], %s1552_s30, %s1552_s30, %s1553_s6  }
  0x14   :  { %s1478_s11 = scalar_lea.hbm %s2015_s0, 8192 }
  0x15   :  { %p1479_p8 = scmp.ne.s32.totalorder %s2015_s0, %s1478_s11  ;;  %p1482_p9 = scmp.lt.u32.totalorder %s1478_s11, %s2015_s0 }
  0x17   :  { %p1484_p10 = pnand %p1482_p9, %p1479_p8 }
  0x19   :  { %1487 = shalt.err (!%p1484_p10)
}
  0x1a   :  { %s1488_s16 = scalar_lea.vmem %s1586_s21, 8192  ;;  %p1493_p12 = scmp.lt.s32.totalorder %s1586_s21, %s1586_s21 }
  0x1b   :  { %p1489_p11 = scmp.ne.s32.totalorder %s1586_s21, %s1488_s16  ;;  %p1494_p13 = scmp.lt.s32.totalorder %s1488_s16, %s1488_s16 }
  0x1d   :  { %p1495_p0 = por %p1494_p13, %p1493_p12 }
  0x1f   :  { %p1496_p1 = pnand %p1495_p0, %p1489_p11 }
  0x21   :  { %1499 = shalt.err (!%p1496_p1)
}
  0x22   :  { %24 = dma.hbm_to_vmem [thread:$0]  %s2015_s0, 8192, %s1586_s21, [#allocation3], %s1552_s30, %s1552_s30, %s1553_s6  }
  0x23   :  { %s1554_s18 = smov [#allocation7]   ;;  %s1500_s23 = scalar_lea.hbm %s2018_s3, 8192 }
  0x24   :  { %s44_s19 = sshll.u32 %s1554_s18, 4  ;;  %p1501_p2 = scmp.ne.s32.totalorder %s2018_s3, %s1500_s23  ;;  %s45_s19 = int_to_ptr.vmem [resolvable:$true] %s44_s19 }
  0x25   :  { %p1504_p3 = scmp.lt.u32.totalorder %s1500_s23, %s2018_s3 }
  0x27   :  { %p1506_p4 = pnand %p1504_p3, %p1501_p2 }
  0x29   :  { %1509 = shalt.err (!%p1506_p4)
}
  0x2a   :  { %s1510_s28 = scalar_lea.vmem %s45_s19, 8192  ;;  %p1515_p6 = scmp.lt.s32.totalorder %s45_s19, %s45_s19 }
  0x2b   :  { %p1511_p5 = scmp.ne.s32.totalorder %s45_s19, %s1510_s28  ;;  %p1516_p7 = scmp.lt.s32.totalorder %s1510_s28, %s1510_s28 }
  0x2d   :  { %p1517_p8 = por %p1516_p7, %p1515_p6 }
  0x2f   :  { %p1518_p9 = pnand %p1517_p8, %p1511_p5 }
  0x31   :  { %1521 = shalt.err (!%p1518_p9)
}
  0x32   :  { %50 = dma.hbm_to_vmem [thread:$0]  %s2018_s3, 8192, %s45_s19, [#allocation6], %s1552_s30, %s1552_s30, %s1553_s6  }
  0x33   :  { %1544 = dma.done.wait [#allocation3], 8192  }
  0x34   :  { %1545 = vsyncadd [#allocation3], 4294959104 }
  0x35   :  { %1546 = dma.done.wait [#allocation6], 16384  }
  0x36   :  { %1547 = vsyncadd [#allocation6], 4294950912  ;;  %v127_v0 = vld [vmem:[#allocation5 + $0x8] sm:$0xff]  ;;  %v129_v1 = vld [vmem:[#allocation5 + $0x18] sm:$0xff] }
  0x37   :  { %v126_v2 = vld [vmem:[#allocation5] sm:$0xff]  ;;  %v1194_v3 = vpack.c.bf16 %v129_v1, %v127_v0  ;;  %v128_v4 = vld [vmem:[#allocation5 + $0x10] sm:$0xff]  ;;  %v131_v5 = vld [vmem:[#allocation5 + $0x28] sm:$0xff] }
  0x38   :  { %v133_v6 = vld [vmem:[#allocation5 + $0x38] sm:$0xff]  ;;  %v1196_v7 = vpack.c.bf16 %v128_v4, %v126_v2  ;;  %v130_v9 = vld [vmem:[#allocation5 + $0x20] sm:$0xff]  ;;  %v132_v10 = vld [vmem:[#allocation5 + $0x30] sm:$0xff] }
  0x39   :  { %v1198_v8 = vpack.c.bf16 %v133_v6, %v131_v5  ;;  %v135_v11 = vld [vmem:[#allocation5 + $0x48] sm:$0xff]  ;;  %1195 = vmatprep.subr.bf16.mxu0 %v1194_v3  ;;  %v137_v12 = vld [vmem:[#allocation5 + $0x58] sm:$0xff]  ;;  %v1200_v13 = vpack.c.bf16 %v132_v10, %v130_v9  ;;  %v134_v15 = vld [vmem:[#allocation5 + $0x40] sm:$0xff] }
  0x3a   :  { %1197 = vmatpush1.bf16.msra.mxu0 %v1196_v7  ;;  %v1202_v14 = vpack.c.bf16 %v137_v12, %v135_v11  ;;  %v136_v16 = vld [vmem:[#allocation5 + $0x50] sm:$0xff]  ;;  %v139_v17 = vld [vmem:[#allocation5 + $0x68] sm:$0xff]  ;;  %v141_v18 = vld [vmem:[#allocation5 + $0x78] sm:$0xff] }
  0x3b   :  { %1199 = vmatprep.subr.bf16.mxu0 %v1198_v8  ;;  %v1204_v19 = vpack.c.bf16 %v136_v16, %v134_v15  ;;  %v1206_v20 = vpack.c.bf16 %v141_v18, %v139_v17  ;;  %v138_v21 = vld [vmem:[#allocation5 + $0x60] sm:$0xff]  ;;  %v140_v22 = vld [vmem:[#allocation5 + $0x70] sm:$0xff]  ;;  %v143_v23 = vld [vmem:[#allocation5 + $0x88] sm:$0xff] }
  0x3c   :  { %v145_v24 = vld [vmem:[#allocation5 + $0x98] sm:$0xff]  ;;  %v1208_v25 = vpack.c.bf16 %v140_v22, %v138_v21  ;;  %v142_v27 = vld [vmem:[#allocation5 + $0x80] sm:$0xff]  ;;  %v144_v28 = vld [vmem:[#allocation5 + $0x90] sm:$0xff] }
  0x3d   :  { %v1210_v26 = vpack.c.bf16 %v145_v24, %v143_v23  ;;  %v147_v29 = vld [vmem:[#allocation5 + $0xa8] sm:$0xff]  ;;  %v149_v30 = vld [vmem:[#allocation5 + $0xb8] sm:$0xff]  ;;  %v1212_v31 = vpack.c.bf16 %v144_v28, %v142_v27  ;;  %v146_v33 = vld [vmem:[#allocation5 + $0xa0] sm:$0xff] }
  0x3e   :  { %1201 = vmatpush1.bf16.msra.mxu0 %v1200_v13  ;;  %v1214_v32 = vpack.c.bf16 %v149_v30, %v147_v29  ;;  %v148_v34 = vld [vmem:[#allocation5 + $0xb0] sm:$0xff]  ;;  %v151_v35 = vld [vmem:[#allocation5 + $0xc8] sm:$0xff]  ;;  %v153_v36 = vld [vmem:[#allocation5 + $0xd8] sm:$0xff] }
  0x3f   :  { %1203 = vmatprep.subr.bf16.mxu0 %v1202_v14  ;;  %v1216_v37 = vpack.c.bf16 %v148_v34, %v146_v33  ;;  %v1218_v38 = vpack.c.bf16 %v153_v36, %v151_v35  ;;  %v150_v39 = vld [vmem:[#allocation5 + $0xc0] sm:$0xff]  ;;  %v152_v40 = vld [vmem:[#allocation5 + $0xd0] sm:$0xff]  ;;  %v63_v41 = vld [vmem:[#allocation2 + $0x8] sm:$0xff] }
  0x40   :  { %v155_v42 = vld [vmem:[#allocation5 + $0xe8] sm:$0xff]  ;;  %v157_v43 = vld [vmem:[#allocation5 + $0xf8] sm:$0xff]  ;;  %266 = vmatprep.mubr.f32.mxu0 %v63_v41  ;;  %v1220_v44 = vpack.c.bf16 %v152_v40, %v150_v39  ;;  %v154_v46 = vld [vmem:[#allocation5 + $0xe0] sm:$0xff] }
  0x41   :  { %v1222_v45 = vpack.c.bf16 %v157_v43, %v155_v42  ;;  %v156_v47 = vld [vmem:[#allocation5 + $0xf0] sm:$0xff]  ;;  %v159_v48 = vld [vmem:[#allocation5 + $0x108] sm:$0xff]  ;;  %v161_v49 = vld [vmem:[#allocation5 + $0x118] sm:$0xff] }
  0x42   :  { %1205 = vmatpush1.bf16.msra.mxu0 %v1204_v19  ;;  %v1224_v50 = vpack.c.bf16 %v156_v47, %v154_v46  ;;  %v1226_v51 = vpack.c.bf16 %v161_v49, %v159_v48  ;;  %v158_v52 = vld [vmem:[#allocation5 + $0x100] sm:$0xff]  ;;  %v160_v53 = vld [vmem:[#allocation5 + $0x110] sm:$0xff]  ;;  %v163_v54 = vld [vmem:[#allocation5 + $0x128] sm:$0xff] }
  0x43   :  { %1207 = vmatprep.subr.bf16.mxu0 %v1206_v20  ;;  %v165_v55 = vld [vmem:[#allocation5 + $0x138] sm:$0xff]  ;;  %v1228_v56 = vpack.c.bf16 %v160_v53, %v158_v52  ;;  %v162_v58 = vld [vmem:[#allocation5 + $0x120] sm:$0xff]  ;;  %v164_v59 = vld [vmem:[#allocation5 + $0x130] sm:$0xff] }
  0x44   :  { %v1230_v57 = vpack.c.bf16 %v165_v55, %v163_v54  ;;  %v167_v60 = vld [vmem:[#allocation5 + $0x148] sm:$0xff]  ;;  %v169_v61 = vld [vmem:[#allocation5 + $0x158] sm:$0xff]  ;;  %v1232_v62 = vpack.c.bf16 %v164_v59, %v162_v58  ;;  %v166_v0 = vld [vmem:[#allocation5 + $0x140] sm:$0xff] }
  0x45   :  { %v1234_v63 = vpack.c.bf16 %v169_v61, %v167_v60  ;;  %v168_v1 = vld [vmem:[#allocation5 + $0x150] sm:$0xff]  ;;  %v171_v2 = vld [vmem:[#allocation5 + $0x168] sm:$0xff]  ;;  %v173_v3 = vld [vmem:[#allocation5 + $0x178] sm:$0xff] }
  0x46   :  { %1209 = vmatpush1.bf16.msra.mxu0 %v1208_v25  ;;  %v1236_v4 = vpack.c.bf16 %v168_v1, %v166_v0  ;;  %v1238_v5 = vpack.c.bf16 %v173_v3, %v171_v2  ;;  %v170_v6 = vld [vmem:[#allocation5 + $0x160] sm:$0xff]  ;;  %v172_v7 = vld [vmem:[#allocation5 + $0x170] sm:$0xff]  ;;  %v175_v8 = vld [vmem:[#allocation5 + $0x188] sm:$0xff] }
  0x47   :  { %1211 = vmatprep.subr.bf16.mxu0 %v1210_v26  ;;  %v177_v9 = vld [vmem:[#allocation5 + $0x198] sm:$0xff]  ;;  %v1240_v10 = vpack.c.bf16 %v172_v7, %v170_v6  ;;  %v174_v12 = vld [vmem:[#allocation5 + $0x180] sm:$0xff]  ;;  %v176_v13 = vld [vmem:[#allocation5 + $0x190] sm:$0xff] }
  0x48   :  { %v1242_v11 = vpack.c.bf16 %v177_v9, %v175_v8  ;;  %v179_v14 = vld [vmem:[#allocation5 + $0x1a8] sm:$0xff]  ;;  %v181_v15 = vld [vmem:[#allocation5 + $0x1b8] sm:$0xff]  ;;  %v1244_v16 = vpack.c.bf16 %v176_v13, %v174_v12  ;;  %v178_v18 = vld [vmem:[#allocation5 + $0x1a0] sm:$0xff] }
  0x49   :  { %v1246_v17 = vpack.c.bf16 %v181_v15, %v179_v14  ;;  %v180_v19 = vld [vmem:[#allocation5 + $0x1b0] sm:$0xff]  ;;  %v183_v20 = vld [vmem:[#allocation5 + $0x1c8] sm:$0xff]  ;;  %v185_v21 = vld [vmem:[#allocation5 + $0x1d8] sm:$0xff] }
  0x4a   :  { %1213 = vmatpush1.bf16.msra.mxu0 %v1212_v31  ;;  %v1248_v22 = vpack.c.bf16 %v180_v19, %v178_v18  ;;  %v1250_v23 = vpack.c.bf16 %v185_v21, %v183_v20  ;;  %v182_v24 = vld [vmem:[#allocation5 + $0x1c0] sm:$0xff]  ;;  %v184_v25 = vld [vmem:[#allocation5 + $0x1d0] sm:$0xff]  ;;  %v187_v26 = vld [vmem:[#allocation5 + $0x1e8] sm:$0xff] }
  0x4b   :  { %1215 = vmatprep.subr.bf16.mxu0 %v1214_v32  ;;  %v189_v27 = vld [vmem:[#allocation5 + $0x1f8] sm:$0xff]  ;;  %v1252_v28 = vpack.c.bf16 %v184_v25, %v182_v24  ;;  %v186_v30 = vld [vmem:[#allocation5 + $0x1e0] sm:$0xff]  ;;  %v188_v31 = vld [vmem:[#allocation5 + $0x1f0] sm:$0xff] }
  0x4c   :  { %v1254_v29 = vpack.c.bf16 %v189_v27, %v187_v26  ;;  %v1256_v32 = vpack.c.bf16 %v188_v31, %v186_v30  ;;  %v62_v33 = vld [vmem:[#allocation2] sm:$0xff]  ;;  %v65_v34 = vld [vmem:[#allocation2 + $0x18] sm:$0xff]  ;;  %v780_v35 = vld [vmem:[#allocation7 + $0x8] sm:$0xff] }
  0x4d   :  { %v782_v36 = vld [vmem:[#allocation7 + $0x18] sm:$0xff]  ;;  %v781_v39 = vld [vmem:[#allocation7 + $0x10] sm:$0xff]  ;;  %v784_v40 = vld [vmem:[#allocation7 + $0x28] sm:$0xff] }
  0x4e   :  { %1217 = vmatpush1.bf16.msra.mxu0 %v1216_v37  ;;  %v779_v37 = vld [vmem:[#allocation7] sm:$0xff]  ;;  %v786_v41 = vld [vmem:[#allocation7 + $0x38] sm:$0xff]  ;;  %v788_v46 = vld [vmem:[#allocation7 + $0x48] sm:$0xff] }
  0x4f   :  { %1219 = vmatprep.subr.bf16.mxu0 %v1218_v38  ;;  %v1258_v38 = vpack.c.bf16 %v782_v36, %v780_v35  ;;  %v1260_v42 = vpack.c.bf16 %v781_v39, %v779_v37  ;;  %v1262_v43 = vpack.c.bf16 %v786_v41, %v784_v40  ;;  %v790_v47 = vld [vmem:[#allocation7 + $0x58] sm:$0xff]  ;;  %v64_v49 = vld [vmem:[#allocation2 + $0x10] sm:$0xff]  ;;  %v67_v53 = vld [vmem:[#allocation2 + $0x28] sm:$0xff] }
  0x50   :  { %v789_v52 = vld [vmem:[#allocation7 + $0x50] sm:$0xff]  ;;  %v792_v54 = vld [vmem:[#allocation7 + $0x68] sm:$0xff]  ;;  %v794_v55 = vld [vmem:[#allocation7 + $0x78] sm:$0xff] }
  0x51   :  { %1259 = vmatprep.subr.bf16.mxu1 %v1258_v38  ;;  %v1270_v58 = vpack.c.bf16 %v794_v55, %v792_v54  ;;  %v791_v59 = vld [vmem:[#allocation7 + $0x60] sm:$0xff]  ;;  %v793_v60 = vld [vmem:[#allocation7 + $0x70] sm:$0xff]  ;;  %v69_v61 = vld [vmem:[#allocation2 + $0x38] sm:$0xff] }
  0x52   :  { %1221 = vmatpush1.bf16.msra.mxu0 %v1220_v44  ;;  %v783_v44 = vld [vmem:[#allocation7 + $0x20] sm:$0xff]  ;;  %1261 = vmatpush1.bf16.msra.mxu1 %v1260_v42  ;;  %v1272_v0 = vpack.c.bf16 %v793_v60, %v791_v59  ;;  %v68_v1 = vld [vmem:[#allocation2 + $0x30] sm:$0xff]  ;;  %v800_v6 = vld [vmem:[#allocation7 + $0xa8] sm:$0xff] }
  0x53   :  { %1223 = vmatprep.subr.bf16.mxu0 %v1222_v45  ;;  %v785_v45 = vld [vmem:[#allocation7 + $0x30] sm:$0xff]  ;;  %1263 = vmatprep.subr.bf16.mxu1 %v1262_v43  ;;  %v795_v3 = vld [vmem:[#allocation7 + $0x80] sm:$0xff]  ;;  %v802_v7 = vld [vmem:[#allocation7 + $0xb8] sm:$0xff] }
  0x54   :  { %v1264_v48 = vpack.c.bf16 %v785_v45, %v783_v44  ;;  %v70_v9 = vld [vmem:[#allocation2 + $0x40] sm:$0xff]  ;;  %v801_v12 = vld [vmem:[#allocation7 + $0xb0] sm:$0xff]  ;;  %v73_v13 = vld [vmem:[#allocation2 + $0x58] sm:$0xff] }
  0x55   :  { %v804_v14 = vld [vmem:[#allocation7 + $0xc8] sm:$0xff]  ;;  %v806_v15 = vld [vmem:[#allocation7 + $0xd8] sm:$0xff]  ;;  %v803_v19 = vld [vmem:[#allocation7 + $0xc0] sm:$0xff] }
  0x56   :  { %1225 = vmatpush1.bf16.msra.mxu0 %v1224_v50  ;;  %v1266_v50 = vpack.c.bf16 %v790_v47, %v788_v46  ;;  %1265 = vmatpush1.bf16.msra.mxu1 %v1264_v48  ;;  %v1282_v18 = vpack.c.bf16 %v806_v15, %v804_v14  ;;  %v805_v20 = vld [vmem:[#allocation7 + $0xd0] sm:$0xff]  ;;  %v75_v21 = vld [vmem:[#allocation2 + $0x68] sm:$0xff]  ;;  %v74_v25 = vld [vmem:[#allocation2 + $0x60] sm:$0xff] }
  0x57   :  { %1227 = vmatprep.subr.bf16.mxu0 %v1226_v51  ;;  %v787_v51 = vld [vmem:[#allocation7 + $0x40] sm:$0xff]  ;;  %v1284_v24 = vpack.c.bf16 %v805_v20, %v803_v19  ;;  %v812_v30 = vld [vmem:[#allocation7 + $0x108] sm:$0xff]  ;;  %v814_v31 = vld [vmem:[#allocation7 + $0x118] sm:$0xff] }
  0x58   :  { %1267 = vmatprep.subr.bf16.mxu1 %v1266_v50  ;;  %v807_v27 = vld [vmem:[#allocation7 + $0xe0] sm:$0xff]  ;;  %v813_v36 = vld [vmem:[#allocation7 + $0x110] sm:$0xff]  ;;  %v79_v37 = vld [vmem:[#allocation2 + $0x88] sm:$0xff] }
  0x59   :  { %v811_v35 = vld [vmem:[#allocation7 + $0x100] sm:$0xff]  ;;  %v816_v38 = vld [vmem:[#allocation7 + $0x128] sm:$0xff]  ;;  %v818_v39 = vld [vmem:[#allocation7 + $0x138] sm:$0xff] }
  0x5a   :  { %1229 = vmatpush1.bf16.msra.mxu0 %v1228_v56  ;;  %v1268_v56 = vpack.c.bf16 %v789_v52, %v787_v51  ;;  %v1292_v40 = vpack.c.bf16 %v813_v36, %v811_v35  ;;  %v78_v41 = vld [vmem:[#allocation2 + $0x80] sm:$0xff]  ;;  %v1294_v42 = vpack.c.bf16 %v818_v39, %v816_v38  ;;  %v817_v44 = vld [vmem:[#allocation7 + $0x130] sm:$0xff]  ;;  %v81_v45 = vld [vmem:[#allocation2 + $0x98] sm:$0xff] }
  0x5b   :  { %1231 = vmatprep.subr.bf16.mxu0 %v1230_v57  ;;  %v66_v57 = vld [vmem:[#allocation2 + $0x20] sm:$0xff]  ;;  %v820_v46 = vld [vmem:[#allocation7 + $0x148] sm:$0xff]  ;;  %v822_v47 = vld [vmem:[#allocation7 + $0x158] sm:$0xff] }
  0x5c   :  { %1269 = vmatpush1.bf16.msra.mxu1 %v1268_v56  ;;  %v815_v43 = vld [vmem:[#allocation7 + $0x120] sm:$0xff]  ;;  %v1298_v50 = vpack.c.bf16 %v822_v47, %v820_v46  ;;  %v821_v52 = vld [vmem:[#allocation7 + $0x150] sm:$0xff]  ;;  %v85_v56 = vld [vmem:[#allocation2 + $0xb8] sm:$0xff] }
  0x5d   :  { %1271 = vmatprep.subr.bf16.mxu1 %v1270_v58  ;;  %v1296_v48 = vpack.c.bf16 %v817_v44, %v815_v43  ;;  %v819_v51 = vld [vmem:[#allocation7 + $0x140] sm:$0xff]  ;;  %v87_v58 = vld [vmem:[#allocation2 + $0xc8] sm:$0xff]  ;;  %v89_v60 = vld [vmem:[#allocation2 + $0xd8] sm:$0xff] }
  0x5e   :  { %1233 = vmatpush1.bf16.msra.mxu0 %v1232_v62  ;;  %v796_v62 = vld [vmem:[#allocation7 + $0x88] sm:$0xff]  ;;  %v1300_v54 = vpack.c.bf16 %v821_v52, %v819_v51  ;;  %v82_v55 = vld [vmem:[#allocation2 + $0xa0] sm:$0xff]  ;;  %v825_v19 = vld [vmem:[#allocation7 + $0x170] sm:$0xff] }
  0x5f   :  { %1235 = vmatprep.subr.bf16.mxu0 %v1234_v63  ;;  %v798_v63 = vld [vmem:[#allocation7 + $0x98] sm:$0xff]  ;;  %v86_v59 = vld [vmem:[#allocation2 + $0xc0] sm:$0xff]  ;;  %v107_v14 = vld [vmem:[#allocation2 + $0x168] sm:$0xff] }
  0x60   :  { %v1274_v2 = vpack.c.bf16 %v798_v63, %v796_v62  ;;  %1273 = vmatpush1.bf16.msra.mxu1 %v1272_v0  ;;  %v91_v62 = vld [vmem:[#allocation2 + $0xe8] sm:$0xff]  ;;  %v90_v63 = vld [vmem:[#allocation2 + $0xe0] sm:$0xff]  ;;  %v93_v0 = vld [vmem:[#allocation2 + $0xf8] sm:$0xff] }
  0x61   :  { %v824_v15 = vld [vmem:[#allocation7 + $0x168] sm:$0xff]  ;;  %v833_v35 = vld [vmem:[#allocation7 + $0x1b0] sm:$0xff]  ;;  %v113_v38 = vld [vmem:[#allocation2 + $0x198] sm:$0xff] }
  0x62   :  { %1237 = vmatpush1.bf16.msra.mxu0 %v1236_v4  ;;  %v797_v4 = vld [vmem:[#allocation7 + $0x90] sm:$0xff]  ;;  %1275 = vmatprep.subr.bf16.mxu1 %v1274_v2  ;;  %v95_v2 = vld [vmem:[#allocation2 + $0x108] sm:$0xff] }
  0x63   :  { %1239 = vmatprep.subr.bf16.mxu0 %v1238_v5  ;;  %v71_v5 = vld [vmem:[#allocation2 + $0x48] sm:$0xff]  ;;  %v1276_v8 = vpack.c.bf16 %v797_v4, %v795_v3  ;;  %v94_v3 = vld [vmem:[#allocation2 + $0x100] sm:$0xff]  ;;  %v97_v4 = vld [vmem:[#allocation2 + $0x118] sm:$0xff] }
  0x64   :  { %v836_v39 = vld [vmem:[#allocation7 + $0x1c8] sm:$0xff]  ;;  %v837_v43 = vld [vmem:[#allocation7 + $0x1d0] sm:$0xff] }
  0x65   :  { %1277 = vmatpush1.bf16.msra.mxu1 %v1276_v8  ;;  %v101_v8 = vld [vmem:[#allocation2 + $0x138] sm:$0xff]  ;;  %v115_v46 = vld [vmem:[#allocation2 + $0x1a8] sm:$0xff]  ;;  %v841_v51 = vld [vmem:[#allocation7 + $0x1f0] sm:$0xff] }
  0x66   :  { %1241 = vmatpush1.bf16.msra.mxu0 %v1240_v10  ;;  %v1278_v10 = vpack.c.bf16 %v802_v7, %v800_v6  ;;  %v99_v6 = vld [vmem:[#allocation2 + $0x128] sm:$0xff]  ;;  %v98_v7 = vld [vmem:[#allocation2 + $0x120] sm:$0xff] }
  0x67   :  { %1243 = vmatprep.subr.bf16.mxu0 %v1242_v11  ;;  %v799_v11 = vld [vmem:[#allocation7 + $0xa0] sm:$0xff]  ;;  %v840_v47 = vld [vmem:[#allocation7 + $0x1e8] sm:$0xff] }
  0x68   :  { %1279 = vmatprep.subr.bf16.mxu1 %v1278_v10  ;;  %v103_v10 = vld [vmem:[#allocation2 + $0x148] sm:$0xff] }
  0x6a   :  { %1245 = vmatpush1.bf16.msra.mxu0 %v1244_v16  ;;  %v1280_v16 = vpack.c.bf16 %v801_v12, %v799_v11  ;;  %v102_v11 = vld [vmem:[#allocation2 + $0x140] sm:$0xff]  ;;  %v105_v12 = vld [vmem:[#allocation2 + $0x158] sm:$0xff] }
  0x6b   :  { %1247 = vmatprep.subr.bf16.mxu0 %v1246_v17  ;;  %v72_v17 = vld [vmem:[#allocation2 + $0x50] sm:$0xff] }
  0x6c   :  { %1281 = vmatpush1.bf16.msra.mxu1 %v1280_v16  ;;  %v826_v16 = vld [vmem:[#allocation7 + $0x178] sm:$0xff] }
  0x6d   :  { %1283 = vmatprep.subr.bf16.mxu1 %v1282_v18  ;;  %v823_v18 = vld [vmem:[#allocation7 + $0x160] sm:$0xff] }
  0x6e   :  { %1249 = vmatpush1.bf16.msra.mxu0 %v1248_v22  ;;  %v808_v22 = vld [vmem:[#allocation7 + $0xe8] sm:$0xff]  ;;  %v1304_v20 = vpack.c.bf16 %v825_v19, %v823_v18 }
  0x6f   :  { %1251 = vmatprep.subr.bf16.mxu0 %v1250_v23  ;;  %v810_v23 = vld [vmem:[#allocation7 + $0xf8] sm:$0xff] }
  0x70   :  { %v1286_v26 = vpack.c.bf16 %v810_v23, %v808_v22  ;;  %1285 = vmatpush1.bf16.msra.mxu1 %v1284_v24  ;;  %v109_v22 = vld [vmem:[#allocation2 + $0x178] sm:$0xff]  ;;  %v828_v23 = vld [vmem:[#allocation7 + $0x188] sm:$0xff] }
  0x71   :  { %v830_v24 = vld [vmem:[#allocation7 + $0x198] sm:$0xff] }
  0x72   :  { %1253 = vmatpush1.bf16.msra.mxu0 %v1252_v28  ;;  %v809_v28 = vld [vmem:[#allocation7 + $0xf0] sm:$0xff]  ;;  %1287 = vmatprep.subr.bf16.mxu1 %v1286_v26  ;;  %v827_v26 = vld [vmem:[#allocation7 + $0x180] sm:$0xff] }
  0x73   :  { %1255 = vmatprep.subr.bf16.mxu0 %v1254_v29  ;;  %v77_v29 = vld [vmem:[#allocation2 + $0x78] sm:$0xff] }
  0x76   :  { %1257 = vmatpush1.bf16.msra.mxu0 %v1256_v32  ;;  %v1288_v32 = vpack.c.bf16 %v809_v28, %v807_v27  ;;  %v829_v27 = vld [vmem:[#allocation7 + $0x190] sm:$0xff] }
  0x77   :  { %v1308_v28 = vpack.c.bf16 %v829_v27, %v827_v26 }
  0x78   :  { %1289 = vmatpush1.bf16.msra.mxu1 %v1288_v32  ;;  %v834_v32 = vld [vmem:[#allocation7 + $0x1b8] sm:$0xff] }
  0x79   :  { %267 = vmatmul.mubr.f32.vlgmr.msra.gmra.mrb[0].mxu0 %v62_v33  ;;  %v76_v33 = vld [vmem:[#allocation2 + $0x70] sm:$0xff] }
  0x7a   :  { %272 = vmatprep.mubr.f32.mxu0 %v65_v34  ;;  %v1290_v34 = vpack.c.bf16 %v814_v31, %v812_v30  ;;  %v111_v30 = vld [vmem:[#allocation2 + $0x188] sm:$0xff] }
  0x7b   :  { %v832_v31 = vld [vmem:[#allocation7 + $0x1a8] sm:$0xff] }
  0x7c   :  { %1291 = vmatprep.subr.bf16.mxu1 %v1290_v34  ;;  %v831_v34 = vld [vmem:[#allocation7 + $0x1a0] sm:$0xff] }
  0x7d   :  { %273 = vmatmul.mubr.f32.gmra.mrb[2].mxu0 %v64_v49  ;;  %1293 = vmatpush1.bf16.msra.mxu1 %v1292_v40  ;;  %v80_v49 = vld [vmem:[#allocation2 + $0x90] sm:$0xff]  ;;  %v1312_v36 = vpack.c.bf16 %v833_v35, %v831_v34  ;;  %v838_v40 = vld [vmem:[#allocation7 + $0x1d8] sm:$0xff] }
  0x7e   :  { %278 = vmatprep.mubr.f32.mxu0 %v67_v53  ;;  %1295 = vmatprep.subr.bf16.mxu1 %v1294_v42  ;;  %v83_v53 = vld [vmem:[#allocation2 + $0xa8] sm:$0xff]  ;;  %v835_v42 = vld [vmem:[#allocation7 + $0x1c0] sm:$0xff] }
  0x7f   :  { %v1316_v44 = vpack.c.bf16 %v837_v43, %v835_v42 }
  0x81   :  { %279 = vmatmul.mubr.f32.gmra.mrb[4].mxu0 %v66_v57  ;;  %1297 = vmatpush1.bf16.msra.mxu1 %v1296_v48  ;;  %v84_v57 = vld [vmem:[#allocation2 + $0xb0] sm:$0xff]  ;;  %v842_v48 = vld [vmem:[#allocation7 + $0x1f8] sm:$0xff] }
  0x82   :  { %284 = vmatprep.mubr.f32.mxu0 %v69_v61  ;;  %1299 = vmatprep.subr.bf16.mxu1 %v1298_v50  ;;  %v88_v61 = vld [vmem:[#allocation2 + $0xd0] sm:$0xff]  ;;  %v839_v50 = vld [vmem:[#allocation7 + $0x1e0] sm:$0xff] }
  0x83   :  { %v1320_v52 = vpack.c.bf16 %v841_v51, %v839_v50 }
  0x85   :  { %285 = vmatmul.mubr.f32.gmra.mrb[6].mxu0 %v68_v1  ;;  %1301 = vmatpush1.bf16.msra.mxu1 %v1300_v54  ;;  %v92_v1 = vld [vmem:[#allocation2 + $0xf0] sm:$0xff]  ;;  %v117_v54 = vld [vmem:[#allocation2 + $0x1b8] sm:$0xff] }
  0x86   :  { %290 = vmatprep.mubr.f32.mxu0 %v71_v5  ;;  %v96_v5 = vld [vmem:[#allocation2 + $0x110] sm:$0xff] }
  0x89   :  { %291 = vmatmul.mubr.f32.gmra.mrb[8].mxu0 %v70_v9  ;;  %v100_v9 = vld [vmem:[#allocation2 + $0x130] sm:$0xff] }
  0x8a   :  { %296 = vmatprep.mubr.f32.mxu0 %v73_v13  ;;  %v104_v13 = vld [vmem:[#allocation2 + $0x150] sm:$0xff] }
  0x8d   :  { %297 = vmatmul.mubr.f32.gmra.mrb[10].mxu0 %v72_v17  ;;  %v1302_v17 = vpack.c.bf16 %v826_v16, %v824_v15 }
  0x8e   :  { %302 = vmatprep.mubr.f32.mxu0 %v75_v21  ;;  %v106_v21 = vld [vmem:[#allocation2 + $0x160] sm:$0xff] }
  0x8f   :  { %1303 = vmatprep.subr.bf16.mxu1 %v1302_v17 }
  0x90   :  { %1305 = vmatpush1.bf16.msra.mxu1 %v1304_v20 }
  0x91   :  { %303 = vmatmul.mubr.f32.gmra.mrb[12].mxu0 %v74_v25  ;;  %v1306_v25 = vpack.c.bf16 %v830_v24, %v828_v23 }
  0x92   :  { %308 = vmatprep.mubr.f32.mxu0 %v77_v29  ;;  %v108_v29 = vld [vmem:[#allocation2 + $0x170] sm:$0xff] }
  0x93   :  { %1307 = vmatprep.subr.bf16.mxu1 %v1306_v25 }
  0x94   :  { %1309 = vmatpush1.bf16.msra.mxu1 %v1308_v28 }
  0x95   :  { %309 = vmatmul.mubr.f32.gmra.mrb[14].mxu0 %v76_v33  ;;  %v1310_v33 = vpack.c.bf16 %v834_v32, %v832_v31 }
  0x96   :  { %314 = vmatprep.mubr.f32.mxu0 %v79_v37  ;;  %v110_v37 = vld [vmem:[#allocation2 + $0x180] sm:$0xff] }
  0x97   :  { %1311 = vmatprep.subr.bf16.mxu1 %v1310_v33 }
  0x98   :  { %1313 = vmatpush1.bf16.msra.mxu1 %v1312_v36 }
  0x99   :  { %315 = vmatmul.mubr.f32.gmra.mrb[16].mxu0 %v78_v41  ;;  %v1314_v41 = vpack.c.bf16 %v838_v40, %v836_v39 }
  0x9a   :  { %320 = vmatprep.mubr.f32.mxu0 %v81_v45  ;;  %v112_v45 = vld [vmem:[#allocation2 + $0x190] sm:$0xff] }
  0x9b   :  { %1315 = vmatprep.subr.bf16.mxu1 %v1314_v41 }
  0x9c   :  { %1317 = vmatpush1.bf16.msra.mxu1 %v1316_v44 }
  0x9d   :  { %321 = vmatmul.mubr.f32.gmra.mrb[18].mxu0 %v80_v49  ;;  %v1318_v49 = vpack.c.bf16 %v842_v48, %v840_v47 }
  0x9e   :  { %326 = vmatprep.mubr.f32.mxu0 %v83_v53  ;;  %v114_v53 = vld [vmem:[#allocation2 + $0x1a0] sm:$0xff] }
  0x9f   :  { %1319 = vmatprep.subr.bf16.mxu1 %v1318_v49 }
  0xa0   :  { %1321 = vmatpush1.bf16.msra.mxu1 %v1320_v52 }
  0xa1   :  { %327 = vmatmul.mubr.f32.gmra.mrb[20].mxu0 %v82_v55  ;;  %v116_v55 = vld [vmem:[#allocation2 + $0x1b0] sm:$0xff] }
  0xa2   :  { %332 = vmatprep.mubr.f32.mxu0 %v85_v56  ;;  %v119_v56 = vld [vmem:[#allocation2 + $0x1c8] sm:$0xff] }
  0xa5   :  { %333 = vmatmul.mubr.f32.gmra.mrb[22].mxu0 %v84_v57  ;;  %v118_v57 = vld [vmem:[#allocation2 + $0x1c0] sm:$0xff] }
  0xa6   :  { %338 = vmatprep.mubr.f32.mxu0 %v87_v58  ;;  %v121_v58 = vld [vmem:[#allocation2 + $0x1d8] sm:$0xff] }
  0xa9   :  { %339 = vmatmul.mubr.f32.gmra.mrb[24].mxu0 %v86_v59  ;;  %v120_v59 = vld [vmem:[#allocation2 + $0x1d0] sm:$0xff] }
  0xaa   :  { %344 = vmatprep.mubr.f32.mxu0 %v89_v60  ;;  %v123_v60 = vld [vmem:[#allocation2 + $0x1e8] sm:$0xff] }
  0xad   :  { %345 = vmatmul.mubr.f32.gmra.mrb[26].mxu0 %v88_v61  ;;  %v122_v61 = vld [vmem:[#allocation2 + $0x1e0] sm:$0xff] }
  0xae   :  { %350 = vmatprep.mubr.f32.mxu0 %v91_v62  ;;  %v125_v62 = vld [vmem:[#allocation2 + $0x1f8] sm:$0xff] }
  0xb1   :  { %351 = vmatmul.mubr.f32.gmra.mrb[28].mxu0 %v90_v63  ;;  %v124_v63 = vld [vmem:[#allocation2 + $0x1f0] sm:$0xff] }
  0xb2   :  { %356 = vmatprep.mubr.f32.mxu0 %v93_v0  ;;  %v192_v0 = vlaneseq }
  0xb5   :  { %357 = vmatmul.mubr.f32.gmra.mrb[30].mxu0 %v92_v1  ;;  %v1638_v1 = vshrl.u32 %v192_v0, 7 }
  0xb6   :  { %362 = vmatprep.mubr.f32.mxu0 %v95_v2 }
  0xb7   :  { %v194_v2 = vsub.s32 0, %v1638_v1 }
  0xb9   :  { %363 = vmatmul.mubr.f32.gmra.mrb[32].mxu0 %v94_v3  ;;  %v190_v3 = vld [vmem:[%s2017_s2] sm:$0x3] }
  0xba   :  { %368 = vmatprep.mubr.f32.mxu0 %v97_v4  ;;  %v198_v4 = vsub.s32 1, %v1638_v1 }
  0xbd   :  { %369 = vmatmul.mubr.f32.gmra.mrb[34].mxu0 %v96_v5  ;;  %v1647_v5 = vrot.slane %v190_v3, %v194_v2 }
  0xbe   :  { %374 = vmatprep.mubr.f32.mxu0 %v99_v6  ;;  %v1651_v6 = vrot.slane %v190_v3, %v198_v4 }
  0xc1   :  { %375 = vmatmul.mubr.f32.gmra.mrb[36].mxu0 %v98_v7 }
  0xc2   :  { %380 = vmatprep.mubr.f32.mxu0 %v101_v8 }
  0xc5   :  { %381 = vmatmul.mubr.f32.gmra.mrb[38].mxu0 %v100_v9 }
  0xc6   :  { %386 = vmatprep.mubr.f32.mxu0 %v103_v10 }
  0xc9   :  { %387 = vmatmul.mubr.f32.gmra.mrb[40].mxu0 %v102_v11 }
  0xca   :  { %392 = vmatprep.mubr.f32.mxu0 %v105_v12 }
  0xcd   :  { %393 = vmatmul.mubr.f32.gmra.mrb[42].mxu0 %v104_v13 }
  0xce   :  { %398 = vmatprep.mubr.f32.mxu0 %v107_v14 }
  0xd1   :  { %399 = vmatmul.mubr.f32.gmra.mrb[44].mxu0 %v106_v21 }
  0xd2   :  { %404 = vmatprep.mubr.f32.mxu0 %v109_v22 }
  0xd5   :  { %405 = vmatmul.mubr.f32.gmra.mrb[46].mxu0 %v108_v29 }
  0xd6   :  { %410 = vmatprep.mubr.f32.mxu0 %v111_v30 }
  0xd9   :  { %411 = vmatmul.mubr.f32.gmra.mrb[48].mxu0 %v110_v37 }
  0xda   :  { %416 = vmatprep.mubr.f32.mxu0 %v113_v38 }
  0xdd   :  { %417 = vmatmul.mubr.f32.gmra.mrb[50].mxu0 %v112_v45 }
  0xde   :  { %422 = vmatprep.mubr.f32.mxu0 %v115_v46 }
  0xe1   :  { %423 = vmatmul.mubr.f32.gmra.mrb[52].mxu0 %v114_v53 }
  0xe2   :  { %428 = vmatprep.mubr.f32.mxu0 %v117_v54 }
  0xe5   :  { %429 = vmatmul.mubr.f32.gmra.mrb[54].mxu0 %v116_v55 }
  0xe6   :  { %434 = vmatprep.mubr.f32.mxu0 %v119_v56 }
  0xe9   :  { %435 = vmatmul.mubr.f32.gmra.mrb[56].mxu0 %v118_v57 }
  0xea   :  { %440 = vmatprep.mubr.f32.mxu0 %v121_v58 }
  0xed   :  { %441 = vmatmul.mubr.f32.gmra.mrb[58].mxu0 %v120_v59 }
  0xee   :  { %446 = vmatprep.mubr.f32.mxu0 %v123_v60 }
  0xf1   :  { %447 = vmatmul.mubr.f32.gmra.mrb[60].mxu0 %v122_v61 }
  0xf2   :  { %452 = vmatprep.mubr.f32.mxu0 %v125_v62 }
  0xf5   :  { %453 = vmatmul.mubr.f32.gmra.mrb[62].mxu0 %v124_v63 }
 0x14c   :  { %v268_v7 = vpop.f32.mrb[0].mxu0 }
 0x14d   :  { %v269_v8 = vadd.f32 %v268_v7, %v1647_v5  ;;  %v270_v9 = vpop.f32.mrb[1].mxu0 }
 0x14e   :  { %v271_v10 = vadd.f32 %v270_v9, %v1651_v6 }
 0x14f   :  { %v523_v11 = vmul.f32 0.70710677, %v269_v8  ;;  %v459_v39 = vmul.f32 0.5, %v269_v8 }
 0x150   :  { %v524_v12 = vmul.f32 0.70710677, %v271_v10  ;;  %v274_v13 = vpop.f32.mrb[2].mxu0  ;;  %v460_v37 = vmul.f32 0.5, %v271_v10 }
 0x151   :  { %1328 = verf.f32 %v523_v11  ;;  %v275_v14 = vadd.f32 %v274_v13, %v1647_v5  ;;  %v276_v15 = vpop.f32.mrb[3].mxu0 }
 0x152   :  { %1330 = verf.f32 %v524_v12  ;;  %v277_v16 = vadd.f32 %v276_v15, %v1651_v6 }
 0x153   :  { %v525_v17 = vmul.f32 0.70710677, %v275_v14  ;;  %v461_v53 = vmul.f32 0.5, %v275_v14 }
 0x154   :  { %v526_v18 = vmul.f32 0.70710677, %v277_v16  ;;  %v280_v19 = vpop.f32.mrb[4].mxu0  ;;  %v462_v49 = vmul.f32 0.5, %v277_v16 }
 0x155   :  { %1332 = verf.f32 %v525_v17  ;;  %v281_v20 = vadd.f32 %v280_v19, %v1647_v5  ;;  %v282_v21 = vpop.f32.mrb[5].mxu0 }
 0x156   :  { %1334 = verf.f32 %v526_v18  ;;  %v283_v22 = vadd.f32 %v282_v21, %v1651_v6 }
 0x157   :  { %v527_v23 = vmul.f32 0.70710677, %v281_v20  ;;  %v463_v8 = vmul.f32 0.5, %v281_v20 }
 0x158   :  { %v528_v24 = vmul.f32 0.70710677, %v283_v22  ;;  %v286_v25 = vpop.f32.mrb[6].mxu0  ;;  %v464_v63 = vmul.f32 0.5, %v283_v22 }
 0x159   :  { %1336 = verf.f32 %v527_v23  ;;  %v1660_v26 = vadd.f32 %v286_v25, %v1647_v5  ;;  %v288_v27 = vpop.f32.mrb[7].mxu0 }
 0x15a   :  { %1338 = verf.f32 %v528_v24  ;;  %v289_v28 = vadd.f32 %v288_v27, %v1651_v6 }
 0x15b   :  { %v1329_v29 = vpop.eup %1328  ;;  %v529_v30 = vmul.f32 0.70710677, %v1660_v26  ;;  %v465_v22 = vmul.f32 0.5, %v1660_v26 }
 0x15c   :  { %v1331_v31 = vpop.eup %1330  ;;  %v651_v32 = vadd.f32 1.0, %v1329_v29  ;;  %v530_v33 = vmul.f32 0.70710677, %v289_v28  ;;  %v292_v34 = vpop.f32.mrb[8].mxu0  ;;  %v466_v18 = vmul.f32 0.5, %v289_v28 }
 0x15d   :  { %1340 = verf.f32 %v529_v30  ;;  %v1665_v35 = vadd.f32 %v292_v34, %v1647_v5  ;;  %v294_v36 = vpop.f32.mrb[9].mxu0  ;;  %v652_v38 = vadd.f32 1.0, %v1331_v31 }
 0x15e   :  { %1342 = verf.f32 %v530_v33  ;;  %v1668_v40 = vadd.f32 %v294_v36, %v1651_v6  ;;  %v715_v48 = vmul.f32 %v651_v32, %v459_v39 }
 0x15f   :  { %v1333_v41 = vpop.eup %1332  ;;  %v531_v42 = vmul.f32 0.70710677, %v1665_v35  ;;  %v716_v43 = vmul.f32 %v652_v38, %v460_v37  ;;  %v467_v37 = vmul.f32 0.5, %v1665_v35 }
 0x160   :  { %v1335_v44 = vpop.eup %1334  ;;  %v653_v45 = vadd.f32 1.0, %v1333_v41  ;;  %v532_v46 = vmul.f32 0.70710677, %v1668_v40  ;;  %v298_v47 = vpop.f32.mrb[10].mxu0  ;;  %v468_v33 = vmul.f32 0.5, %v1668_v40 }
 0x161   :  { %v654_v50 = vadd.f32 1.0, %v1335_v44  ;;  %1344 = verf.f32 %v531_v42  ;;  %v1673_v51 = vadd.f32 %v298_v47, %v1647_v5  ;;  %v300_v52 = vpop.f32.mrb[11].mxu0  ;;  %919 = vmatprep.mubr.f32.mxu1 %v716_v43 }
 0x162   :  { %1346 = verf.f32 %v532_v46  ;;  %v1676_v54 = vadd.f32 %v300_v52, %v1651_v6  ;;  %920 = vmatmul.mubr.f32.vlgmr.msra.gmra.mrb[0].mxu1 %v715_v48  ;;  %v717_v62 = vmul.f32 %v653_v45, %v461_v53 }
 0x163   :  { %v1337_v55 = vpop.eup %1336  ;;  %v533_v56 = vmul.f32 0.70710677, %v1673_v51  ;;  %v718_v57 = vmul.f32 %v654_v50, %v462_v49  ;;  %v469_v50 = vmul.f32 0.5, %v1673_v51 }
 0x164   :  { %v1339_v58 = vpop.eup %1338  ;;  %v655_v59 = vadd.f32 1.0, %v1337_v55  ;;  %v534_v60 = vmul.f32 0.70710677, %v1676_v54  ;;  %v304_v61 = vpop.f32.mrb[12].mxu0  ;;  %v470_v47 = vmul.f32 0.5, %v1676_v54 }
 0x165   :  { %v656_v0 = vadd.f32 1.0, %v1339_v58  ;;  %1348 = verf.f32 %v533_v56  ;;  %v1681_v3 = vadd.f32 %v304_v61, %v1647_v5  ;;  %v306_v7 = vpop.f32.mrb[13].mxu0  ;;  %925 = vmatprep.mubr.f32.mxu1 %v718_v57 }
 0x166   :  { %1350 = verf.f32 %v534_v60  ;;  %v1684_v9 = vadd.f32 %v306_v7, %v1651_v6  ;;  %926 = vmatmul.mubr.f32.gmra.mrb[2].mxu1 %v717_v62  ;;  %v719_v17 = vmul.f32 %v655_v59, %v463_v8 }
 0x167   :  { %v1341_v10 = vpop.eup %1340  ;;  %v535_v11 = vmul.f32 0.70710677, %v1681_v3  ;;  %v720_v12 = vmul.f32 %v656_v0, %v464_v63  ;;  %v471_v0 = vmul.f32 0.5, %v1681_v3 }
 0x168   :  { %v1343_v13 = vpop.eup %1342  ;;  %v657_v14 = vadd.f32 1.0, %v1341_v10  ;;  %v536_v15 = vmul.f32 0.70710677, %v1684_v9  ;;  %v310_v16 = vpop.f32.mrb[14].mxu0  ;;  %v472_v61 = vmul.f32 0.5, %v1684_v9 }
 0x169   :  { %v658_v19 = vadd.f32 1.0, %v1343_v13  ;;  %1352 = verf.f32 %v535_v11  ;;  %v1689_v20 = vadd.f32 %v310_v16, %v1647_v5  ;;  %v312_v21 = vpop.f32.mrb[15].mxu0  ;;  %931 = vmatprep.mubr.f32.mxu1 %v720_v12 }
 0x16a   :  { %1354 = verf.f32 %v536_v15  ;;  %v1693_v23 = vadd.f32 %v312_v21, %v1651_v6  ;;  %932 = vmatmul.mubr.f32.gmra.mrb[4].mxu1 %v719_v17  ;;  %v721_v32 = vmul.f32 %v657_v14, %v465_v22 }
 0x16b   :  { %v1345_v24 = vpop.eup %1344  ;;  %v537_v25 = vmul.f32 0.70710677, %v1689_v20  ;;  %v722_v27 = vmul.f32 %v658_v19, %v466_v18  ;;  %v473_v19 = vmul.f32 0.5, %v1689_v20 }
 0x16c   :  { %v1347_v29 = vpop.eup %1346  ;;  %v659_v28 = vadd.f32 1.0, %v1345_v24  ;;  %v538_v30 = vmul.f32 0.70710677, %v1693_v23  ;;  %v316_v31 = vpop.f32.mrb[16].mxu0  ;;  %v474_v16 = vmul.f32 0.5, %v1693_v23 }
 0x16d   :  { %v660_v34 = vadd.f32 1.0, %v1347_v29  ;;  %1356 = verf.f32 %v537_v25  ;;  %v1699_v26 = vadd.f32 %v316_v31, %v1647_v5  ;;  %v318_v36 = vpop.f32.mrb[17].mxu0  ;;  %937 = vmatprep.mubr.f32.mxu1 %v722_v27 }
 0x16e   :  { %1358 = verf.f32 %v538_v30  ;;  %v1703_v38 = vadd.f32 %v318_v36, %v1651_v6  ;;  %938 = vmatmul.mubr.f32.gmra.mrb[6].mxu1 %v721_v32  ;;  %v723_v46 = vmul.f32 %v659_v28, %v467_v37 }
 0x16f   :  { %v1349_v39 = vpop.eup %1348  ;;  %v539_v41 = vmul.f32 0.70710677, %v1699_v26  ;;  %v724_v42 = vmul.f32 %v660_v34, %v468_v33  ;;  %v475_v34 = vmul.f32 0.5, %v1699_v26 }
 0x170   :  { %v1351_v43 = vpop.eup %1350  ;;  %v661_v40 = vadd.f32 1.0, %v1349_v39  ;;  %v540_v44 = vmul.f32 0.70710677, %v1703_v38  ;;  %v322_v45 = vpop.f32.mrb[18].mxu0  ;;  %v476_v31 = vmul.f32 0.5, %v1703_v38 }
 0x171   :  { %v662_v48 = vadd.f32 1.0, %v1351_v43  ;;  %1360 = verf.f32 %v539_v41  ;;  %v1709_v35 = vadd.f32 %v322_v45, %v1647_v5  ;;  %v324_v49 = vpop.f32.mrb[19].mxu0  ;;  %943 = vmatprep.mubr.f32.mxu1 %v724_v42 }
 0x172   :  { %1362 = verf.f32 %v540_v44  ;;  %v1713_v52 = vadd.f32 %v324_v49, %v1651_v6  ;;  %944 = vmatmul.mubr.f32.gmra.mrb[8].mxu1 %v723_v46  ;;  %v725_v60 = vmul.f32 %v661_v40, %v469_v50 }
 0x173   :  { %v1353_v53 = vpop.eup %1352  ;;  %v541_v55 = vmul.f32 0.70710677, %v1709_v35  ;;  %v726_v56 = vmul.f32 %v662_v48, %v470_v47  ;;  %v477_v48 = vmul.f32 0.5, %v1709_v35 }
 0x174   :  { %v1355_v57 = vpop.eup %1354  ;;  %v663_v54 = vadd.f32 1.0, %v1353_v53  ;;  %v542_v58 = vmul.f32 0.70710677, %v1713_v52  ;;  %v328_v59 = vpop.f32.mrb[20].mxu0  ;;  %v478_v45 = vmul.f32 0.5, %v1713_v52 }
 0x175   :  { %v664_v62 = vadd.f32 1.0, %v1355_v57  ;;  %1364 = verf.f32 %v541_v55  ;;  %v1719_v51 = vadd.f32 %v328_v59, %v1647_v5  ;;  %v330_v63 = vpop.f32.mrb[21].mxu0  ;;  %949 = vmatprep.mubr.f32.mxu1 %v726_v56 }
 0x176   :  { %1366 = verf.f32 %v542_v58  ;;  %v1723_v7 = vadd.f32 %v330_v63, %v1651_v6  ;;  %950 = vmatmul.mubr.f32.gmra.mrb[10].mxu1 %v725_v60  ;;  %v727_v15 = vmul.f32 %v663_v54, %v471_v0 }
 0x177   :  { %v1357_v8 = vpop.eup %1356  ;;  %v543_v10 = vmul.f32 0.70710677, %v1719_v51  ;;  %v728_v11 = vmul.f32 %v664_v62, %v472_v61  ;;  %v479_v62 = vmul.f32 0.5, %v1719_v51 }
 0x178   :  { %v1359_v12 = vpop.eup %1358  ;;  %v665_v9 = vadd.f32 1.0, %v1357_v8  ;;  %v544_v13 = vmul.f32 0.70710677, %v1723_v7  ;;  %v334_v14 = vpop.f32.mrb[22].mxu0  ;;  %v480_v59 = vmul.f32 0.5, %v1723_v7 }
 0x179   :  { %v666_v17 = vadd.f32 1.0, %v1359_v12  ;;  %1368 = verf.f32 %v543_v10  ;;  %v1729_v3 = vadd.f32 %v334_v14, %v1647_v5  ;;  %v336_v18 = vpop.f32.mrb[23].mxu0  ;;  %955 = vmatprep.mubr.f32.mxu1 %v728_v11 }
 0x17a   :  { %1370 = verf.f32 %v544_v13  ;;  %v1733_v21 = vadd.f32 %v336_v18, %v1651_v6  ;;  %956 = vmatmul.mubr.f32.gmra.mrb[12].mxu1 %v727_v15  ;;  %v729_v30 = vmul.f32 %v665_v9, %v473_v19 }
 0x17b   :  { %v1361_v22 = vpop.eup %1360  ;;  %v545_v24 = vmul.f32 0.70710677, %v1729_v3  ;;  %v730_v25 = vmul.f32 %v666_v17, %v474_v16  ;;  %v481_v17 = vmul.f32 0.5, %v1729_v3 }
 0x17c   :  { %v1363_v27 = vpop.eup %1362  ;;  %v667_v23 = vadd.f32 1.0, %v1361_v22  ;;  %v546_v29 = vmul.f32 0.70710677, %v1733_v21  ;;  %v340_v28 = vpop.f32.mrb[24].mxu0  ;;  %v482_v14 = vmul.f32 0.5, %v1733_v21 }
 0x17d   :  { %v668_v32 = vadd.f32 1.0, %v1363_v27  ;;  %1372 = verf.f32 %v545_v24  ;;  %v1739_v20 = vadd.f32 %v340_v28, %v1647_v5  ;;  %v342_v33 = vpop.f32.mrb[25].mxu0  ;;  %961 = vmatprep.mubr.f32.mxu1 %v730_v25 }
 0x17e   :  { %1374 = verf.f32 %v546_v29  ;;  %v1743_v36 = vadd.f32 %v342_v33, %v1651_v6  ;;  %962 = vmatmul.mubr.f32.gmra.mrb[14].mxu1 %v729_v30  ;;  %v731_v44 = vmul.f32 %v667_v23, %v475_v34 }
 0x17f   :  { %v1365_v37 = vpop.eup %1364  ;;  %v547_v39 = vmul.f32 0.70710677, %v1739_v20  ;;  %v732_v41 = vmul.f32 %v668_v32, %v476_v31  ;;  %v483_v32 = vmul.f32 0.5, %v1739_v20 }
 0x180   :  { %v1367_v42 = vpop.eup %1366  ;;  %v669_v38 = vadd.f32 1.0, %v1365_v37  ;;  %v548_v43 = vmul.f32 0.70710677, %v1743_v36  ;;  %v346_v40 = vpop.f32.mrb[26].mxu0  ;;  %v484_v28 = vmul.f32 0.5, %v1743_v36 }
 0x181   :  { %v670_v46 = vadd.f32 1.0, %v1367_v42  ;;  %1376 = verf.f32 %v547_v39  ;;  %v1749_v26 = vadd.f32 %v346_v40, %v1647_v5  ;;  %v348_v47 = vpop.f32.mrb[27].mxu0  ;;  %967 = vmatprep.mubr.f32.mxu1 %v732_v41 }
 0x182   :  { %1378 = verf.f32 %v548_v43  ;;  %v1753_v49 = vadd.f32 %v348_v47, %v1651_v6  ;;  %968 = vmatmul.mubr.f32.gmra.mrb[16].mxu1 %v731_v44  ;;  %v733_v58 = vmul.f32 %v669_v38, %v477_v48 }
 0x183   :  { %v1369_v50 = vpop.eup %1368  ;;  %v549_v53 = vmul.f32 0.70710677, %v1749_v26  ;;  %v734_v55 = vmul.f32 %v670_v46, %v478_v45  ;;  %v485_v46 = vmul.f32 0.5, %v1749_v26 }
 0x184   :  { %v1371_v56 = vpop.eup %1370  ;;  %v671_v52 = vadd.f32 1.0, %v1369_v50  ;;  %v550_v57 = vmul.f32 0.70710677, %v1753_v49  ;;  %v352_v54 = vpop.f32.mrb[28].mxu0  ;;  %v486_v40 = vmul.f32 0.5, %v1753_v49 }
 0x185   :  { %v672_v60 = vadd.f32 1.0, %v1371_v56  ;;  %1380 = verf.f32 %v549_v53  ;;  %v1759_v35 = vadd.f32 %v352_v54, %v1647_v5  ;;  %v354_v61 = vpop.f32.mrb[29].mxu0  ;;  %973 = vmatprep.mubr.f32.mxu1 %v734_v55 }
 0x186   :  { %1382 = verf.f32 %v550_v57  ;;  %v1763_v63 = vadd.f32 %v354_v61, %v1651_v6  ;;  %974 = vmatmul.mubr.f32.gmra.mrb[18].mxu1 %v733_v58  ;;  %v735_v13 = vmul.f32 %v671_v52, %v479_v62 }
 0x187   :  { %v1373_v0 = vpop.eup %1372  ;;  %v551_v8 = vmul.f32 0.70710677, %v1759_v35  ;;  %v736_v10 = vmul.f32 %v672_v60, %v480_v59  ;;  %v487_v60 = vmul.f32 0.5, %v1759_v35 }
 0x188   :  { %v1375_v11 = vpop.eup %1374  ;;  %v673_v7 = vadd.f32 1.0, %v1373_v0  ;;  %v552_v12 = vmul.f32 0.70710677, %v1763_v63  ;;  %v358_v9 = vpop.f32.mrb[30].mxu0  ;;  %v488_v54 = vmul.f32 0.5, %v1763_v63 }
 0x189   :  { %v674_v15 = vadd.f32 1.0, %v1375_v11  ;;  %1384 = verf.f32 %v551_v8  ;;  %v1769_v51 = vadd.f32 %v358_v9, %v1647_v5  ;;  %v360_v16 = vpop.f32.mrb[31].mxu0  ;;  %979 = vmatprep.mubr.f32.mxu1 %v736_v10 }
 0x18a   :  { %1386 = verf.f32 %v552_v12  ;;  %v1773_v18 = vadd.f32 %v360_v16, %v1651_v6  ;;  %980 = vmatmul.mubr.f32.gmra.mrb[20].mxu1 %v735_v13  ;;  %v737_v29 = vmul.f32 %v673_v7, %v481_v17 }
 0x18b   :  { %v1377_v19 = vpop.eup %1376  ;;  %v553_v22 = vmul.f32 0.70710677, %v1769_v51  ;;  %v738_v24 = vmul.f32 %v674_v15, %v482_v14  ;;  %v489_v15 = vmul.f32 0.5, %v1769_v51 }
 0x18c   :  { %v1379_v25 = vpop.eup %1378  ;;  %v675_v21 = vadd.f32 1.0, %v1377_v19  ;;  %v554_v27 = vmul.f32 0.70710677, %v1773_v18  ;;  %v364_v23 = vpop.f32.mrb[32].mxu0  ;;  %v490_v9 = vmul.f32 0.5, %v1773_v18 }
 0x18d   :  { %v676_v30 = vadd.f32 1.0, %v1379_v25  ;;  %1388 = verf.f32 %v553_v22  ;;  %v1779_v3 = vadd.f32 %v364_v23, %v1647_v5  ;;  %v366_v31 = vpop.f32.mrb[33].mxu0  ;;  %985 = vmatprep.mubr.f32.mxu1 %v738_v24 }
 0x18e   :  { %1390 = verf.f32 %v554_v27  ;;  %v1783_v33 = vadd.f32 %v366_v31, %v1651_v6  ;;  %986 = vmatmul.mubr.f32.gmra.mrb[22].mxu1 %v737_v29  ;;  %v739_v43 = vmul.f32 %v675_v21, %v483_v32 }
 0x18f   :  { %v1381_v34 = vpop.eup %1380  ;;  %v555_v37 = vmul.f32 0.70710677, %v1779_v3  ;;  %v740_v39 = vmul.f32 %v676_v30, %v484_v28  ;;  %v491_v30 = vmul.f32 0.5, %v1779_v3 }
 0x190   :  { %v1383_v41 = vpop.eup %1382  ;;  %v677_v36 = vadd.f32 1.0, %v1381_v34  ;;  %v556_v42 = vmul.f32 0.70710677, %v1783_v33  ;;  %v370_v38 = vpop.f32.mrb[34].mxu0  ;;  %v492_v23 = vmul.f32 0.5, %v1783_v33 }
 0x191   :  { %v678_v44 = vadd.f32 1.0, %v1383_v41  ;;  %1392 = verf.f32 %v555_v37  ;;  %v1789_v20 = vadd.f32 %v370_v38, %v1647_v5  ;;  %v372_v45 = vpop.f32.mrb[35].mxu0  ;;  %991 = vmatprep.mubr.f32.mxu1 %v740_v39 }
 0x192   :  { %1394 = verf.f32 %v556_v42  ;;  %v1793_v47 = vadd.f32 %v372_v45, %v1651_v6  ;;  %992 = vmatmul.mubr.f32.gmra.mrb[24].mxu1 %v739_v43  ;;  %v741_v57 = vmul.f32 %v677_v36, %v485_v46 }
 0x193   :  { %v1385_v48 = vpop.eup %1384  ;;  %v557_v50 = vmul.f32 0.70710677, %v1789_v20  ;;  %v742_v53 = vmul.f32 %v678_v44, %v486_v40  ;;  %v493_v44 = vmul.f32 0.5, %v1789_v20 }
 0x194   :  { %v1387_v55 = vpop.eup %1386  ;;  %v679_v49 = vadd.f32 1.0, %v1385_v48  ;;  %v558_v56 = vmul.f32 0.70710677, %v1793_v47  ;;  %v376_v52 = vpop.f32.mrb[36].mxu0  ;;  %v494_v38 = vmul.f32 0.5, %v1793_v47 }
 0x195   :  { %v680_v58 = vadd.f32 1.0, %v1387_v55  ;;  %1396 = verf.f32 %v557_v50  ;;  %v1799_v26 = vadd.f32 %v376_v52, %v1647_v5  ;;  %v378_v59 = vpop.f32.mrb[37].mxu0  ;;  %997 = vmatprep.mubr.f32.mxu1 %v742_v53 }
 0x196   :  { %1398 = verf.f32 %v558_v56  ;;  %v1803_v61 = vadd.f32 %v378_v59, %v1651_v6  ;;  %998 = vmatmul.mubr.f32.gmra.mrb[26].mxu1 %v741_v57  ;;  %v743_v12 = vmul.f32 %v679_v49, %v487_v60 }
 0x197   :  { %v1389_v62 = vpop.eup %1388  ;;  %v559_v0 = vmul.f32 0.70710677, %v1799_v26  ;;  %v744_v8 = vmul.f32 %v680_v58, %v488_v54  ;;  %v495_v58 = vmul.f32 0.5, %v1799_v26 }
 0x198   :  { %v1391_v10 = vpop.eup %1390  ;;  %v681_v63 = vadd.f32 1.0, %v1389_v62  ;;  %v560_v11 = vmul.f32 0.70710677, %v1803_v61  ;;  %v382_v7 = vpop.f32.mrb[38].mxu0  ;;  %v496_v52 = vmul.f32 0.5, %v1803_v61 }
 0x199   :  { %v682_v13 = vadd.f32 1.0, %v1391_v10  ;;  %1400 = verf.f32 %v559_v0  ;;  %v1809_v35 = vadd.f32 %v382_v7, %v1647_v5  ;;  %v384_v14 = vpop.f32.mrb[39].mxu0  ;;  %1003 = vmatprep.mubr.f32.mxu1 %v744_v8 }
 0x19a   :  { %1402 = verf.f32 %v560_v11  ;;  %v1813_v16 = vadd.f32 %v384_v14, %v1651_v6  ;;  %1004 = vmatmul.mubr.f32.gmra.mrb[28].mxu1 %v743_v12  ;;  %v745_v27 = vmul.f32 %v681_v63, %v489_v15 }
 0x19b   :  { %v1393_v17 = vpop.eup %1392  ;;  %v561_v19 = vmul.f32 0.70710677, %v1809_v35  ;;  %v746_v22 = vmul.f32 %v682_v13, %v490_v9  ;;  %v497_v13 = vmul.f32 0.5, %v1809_v35 }
 0x19c   :  { %v1395_v24 = vpop.eup %1394  ;;  %v683_v18 = vadd.f32 1.0, %v1393_v17  ;;  %v562_v25 = vmul.f32 0.70710677, %v1813_v16  ;;  %v388_v21 = vpop.f32.mrb[40].mxu0  ;;  %v498_v7 = vmul.f32 0.5, %v1813_v16 }
 0x19d   :  { %v684_v29 = vadd.f32 1.0, %v1395_v24  ;;  %1404 = verf.f32 %v561_v19  ;;  %v1819_v51 = vadd.f32 %v388_v21, %v1647_v5  ;;  %v390_v28 = vpop.f32.mrb[41].mxu0  ;;  %1009 = vmatprep.mubr.f32.mxu1 %v746_v22 }
 0x19e   :  { %1406 = verf.f32 %v562_v25  ;;  %v1823_v31 = vadd.f32 %v390_v28, %v1651_v6  ;;  %1010 = vmatmul.mubr.f32.gmra.mrb[30].mxu1 %v745_v27  ;;  %v747_v42 = vmul.f32 %v683_v18, %v491_v30 }
 0x19f   :  { %v1397_v32 = vpop.eup %1396  ;;  %v563_v34 = vmul.f32 0.70710677, %v1819_v51  ;;  %v748_v37 = vmul.f32 %v684_v29, %v492_v23  ;;  %v499_v29 = vmul.f32 0.5, %v1819_v51 }
 0x1a0   :  { %v1399_v39 = vpop.eup %1398  ;;  %v685_v33 = vadd.f32 1.0, %v1397_v32  ;;  %v564_v41 = vmul.f32 0.70710677, %v1823_v31  ;;  %v394_v36 = vpop.f32.mrb[42].mxu0  ;;  %v500_v21 = vmul.f32 0.5, %v1823_v31 }
 0x1a1   :  { %v686_v43 = vadd.f32 1.0, %v1399_v39  ;;  %1408 = verf.f32 %v563_v34  ;;  %v1829_v3 = vadd.f32 %v394_v36, %v1647_v5  ;;  %v396_v40 = vpop.f32.mrb[43].mxu0  ;;  %1015 = vmatprep.mubr.f32.mxu1 %v748_v37 }
 0x1a2   :  { %1410 = verf.f32 %v564_v41  ;;  %v1833_v45 = vadd.f32 %v396_v40, %v1651_v6  ;;  %1016 = vmatmul.mubr.f32.gmra.mrb[32].mxu1 %v747_v42  ;;  %v749_v56 = vmul.f32 %v685_v33, %v493_v44 }
 0x1a3   :  { %v1401_v46 = vpop.eup %1400  ;;  %v565_v48 = vmul.f32 0.70710677, %v1829_v3  ;;  %v750_v50 = vmul.f32 %v686_v43, %v494_v38  ;;  %v501_v43 = vmul.f32 0.5, %v1829_v3 }
 0x1a4   :  { %v1403_v53 = vpop.eup %1402  ;;  %v687_v47 = vadd.f32 1.0, %v1401_v46  ;;  %v566_v55 = vmul.f32 0.70710677, %v1833_v45  ;;  %v400_v49 = vpop.f32.mrb[44].mxu0  ;;  %v502_v36 = vmul.f32 0.5, %v1833_v45 }
 0x1a5   :  { %v688_v57 = vadd.f32 1.0, %v1403_v53  ;;  %1412 = verf.f32 %v565_v48  ;;  %v1839_v20 = vadd.f32 %v400_v49, %v1647_v5  ;;  %v402_v54 = vpop.f32.mrb[45].mxu0  ;;  %1021 = vmatprep.mubr.f32.mxu1 %v750_v50 }
 0x1a6   :  { %1414 = verf.f32 %v566_v55  ;;  %v1843_v59 = vadd.f32 %v402_v54, %v1651_v6  ;;  %1022 = vmatmul.mubr.f32.gmra.mrb[34].mxu1 %v749_v56  ;;  %v751_v11 = vmul.f32 %v687_v47, %v495_v58 }
 0x1a7   :  { %v1405_v60 = vpop.eup %1404  ;;  %v567_v62 = vmul.f32 0.70710677, %v1839_v20  ;;  %v752_v0 = vmul.f32 %v688_v57, %v496_v52  ;;  %v503_v57 = vmul.f32 0.5, %v1839_v20 }
 0x1a8   :  { %v1407_v8 = vpop.eup %1406  ;;  %v689_v61 = vadd.f32 1.0, %v1405_v60  ;;  %v568_v10 = vmul.f32 0.70710677, %v1843_v59  ;;  %v406_v63 = vpop.f32.mrb[46].mxu0  ;;  %v504_v49 = vmul.f32 0.5, %v1843_v59 }
 0x1a9   :  { %v690_v12 = vadd.f32 1.0, %v1407_v8  ;;  %1416 = verf.f32 %v567_v62  ;;  %v1849_v26 = vadd.f32 %v406_v63, %v1647_v5  ;;  %v408_v9 = vpop.f32.mrb[47].mxu0  ;;  %1027 = vmatprep.mubr.f32.mxu1 %v752_v0 }
 0x1aa   :  { %1418 = verf.f32 %v568_v10  ;;  %v1853_v14 = vadd.f32 %v408_v9, %v1651_v6  ;;  %1028 = vmatmul.mubr.f32.gmra.mrb[36].mxu1 %v751_v11  ;;  %v753_v25 = vmul.f32 %v689_v61, %v497_v13 }
 0x1ab   :  { %v1409_v15 = vpop.eup %1408  ;;  %v569_v17 = vmul.f32 0.70710677, %v1849_v26  ;;  %v754_v19 = vmul.f32 %v690_v12, %v498_v7  ;;  %v505_v12 = vmul.f32 0.5, %v1849_v26 }
 0x1ac   :  { %v1411_v22 = vpop.eup %1410  ;;  %v691_v16 = vadd.f32 1.0, %v1409_v15  ;;  %v570_v24 = vmul.f32 0.70710677, %v1853_v14  ;;  %v412_v18 = vpop.f32.mrb[48].mxu0  ;;  %v506_v63 = vmul.f32 0.5, %v1853_v14 }
 0x1ad   :  { %v692_v27 = vadd.f32 1.0, %v1411_v22  ;;  %1420 = verf.f32 %v569_v17  ;;  %v1859_v35 = vadd.f32 %v412_v18, %v1647_v5  ;;  %v414_v23 = vpop.f32.mrb[49].mxu0  ;;  %1033 = vmatprep.mubr.f32.mxu1 %v754_v19 }
 0x1ae   :  { %1422 = verf.f32 %v570_v24  ;;  %v1863_v28 = vadd.f32 %v414_v23, %v1651_v6  ;;  %1034 = vmatmul.mubr.f32.gmra.mrb[38].mxu1 %v753_v25  ;;  %v755_v41 = vmul.f32 %v691_v16, %v499_v29 }
 0x1af   :  { %v1413_v30 = vpop.eup %1412  ;;  %v571_v32 = vmul.f32 0.70710677, %v1859_v35  ;;  %v756_v34 = vmul.f32 %v692_v27, %v500_v21  ;;  %v507_v27 = vmul.f32 0.5, %v1859_v35 }
 0x1b0   :  { %v1415_v37 = vpop.eup %1414  ;;  %v693_v31 = vadd.f32 1.0, %v1413_v30  ;;  %v572_v39 = vmul.f32 0.70710677, %v1863_v28  ;;  %v418_v33 = vpop.f32.mrb[50].mxu0  ;;  %v508_v18 = vmul.f32 0.5, %v1863_v28 }
 0x1b1   :  { %v694_v42 = vadd.f32 1.0, %v1415_v37  ;;  %1424 = verf.f32 %v571_v32  ;;  %v1869_v51 = vadd.f32 %v418_v33, %v1647_v5  ;;  %v420_v38 = vpop.f32.mrb[51].mxu0  ;;  %1039 = vmatprep.mubr.f32.mxu1 %v756_v34 }
 0x1b2   :  { %1426 = verf.f32 %v572_v39  ;;  %v1873_v40 = vadd.f32 %v420_v38, %v1651_v6  ;;  %1040 = vmatmul.mubr.f32.gmra.mrb[40].mxu1 %v755_v41  ;;  %v757_v55 = vmul.f32 %v693_v31, %v501_v43 }
 0x1b3   :  { %v1417_v44 = vpop.eup %1416  ;;  %v573_v46 = vmul.f32 0.70710677, %v1869_v51  ;;  %v758_v48 = vmul.f32 %v694_v42, %v502_v36  ;;  %v509_v42 = vmul.f32 0.5, %v1869_v51 }
 0x1b4   :  { %v1419_v50 = vpop.eup %1418  ;;  %v695_v45 = vadd.f32 1.0, %v1417_v44  ;;  %v574_v53 = vmul.f32 0.70710677, %v1873_v40  ;;  %v424_v47 = vpop.f32.mrb[52].mxu0  ;;  %v510_v33 = vmul.f32 0.5, %v1873_v40 }
 0x1b5   :  { %v696_v56 = vadd.f32 1.0, %v1419_v50  ;;  %1428 = verf.f32 %v573_v46  ;;  %v1879_v3 = vadd.f32 %v424_v47, %v1647_v5  ;;  %v426_v52 = vpop.f32.mrb[53].mxu0  ;;  %1045 = vmatprep.mubr.f32.mxu1 %v758_v48 }
 0x1b6   :  { %1430 = verf.f32 %v574_v53  ;;  %v1883_v54 = vadd.f32 %v426_v52, %v1651_v6  ;;  %1046 = vmatmul.mubr.f32.gmra.mrb[42].mxu1 %v757_v55  ;;  %v759_v10 = vmul.f32 %v695_v45, %v503_v57 }
 0x1b7   :  { %v1421_v58 = vpop.eup %1420  ;;  %v575_v60 = vmul.f32 0.70710677, %v1879_v3  ;;  %v760_v62 = vmul.f32 %v696_v56, %v504_v49  ;;  %v511_v56 = vmul.f32 0.5, %v1879_v3 }
 0x1b8   :  { %v1423_v0 = vpop.eup %1422  ;;  %v697_v59 = vadd.f32 1.0, %v1421_v58  ;;  %v576_v8 = vmul.f32 0.70710677, %v1883_v54  ;;  %v430_v61 = vpop.f32.mrb[54].mxu0  ;;  %v512_v47 = vmul.f32 0.5, %v1883_v54 }
 0x1b9   :  { %v698_v11 = vadd.f32 1.0, %v1423_v0  ;;  %1432 = verf.f32 %v575_v60  ;;  %v1889_v20 = vadd.f32 %v430_v61, %v1647_v5  ;;  %v432_v7 = vpop.f32.mrb[55].mxu0  ;;  %1051 = vmatprep.mubr.f32.mxu1 %v760_v62 }
 0x1ba   :  { %1434 = verf.f32 %v576_v8  ;;  %v1893_v9 = vadd.f32 %v432_v7, %v1651_v6  ;;  %1052 = vmatmul.mubr.f32.gmra.mrb[44].mxu1 %v759_v10  ;;  %v761_v24 = vmul.f32 %v697_v59, %v505_v12 }
 0x1bb   :  { %v1425_v13 = vpop.eup %1424  ;;  %v577_v15 = vmul.f32 0.70710677, %v1889_v20  ;;  %v762_v17 = vmul.f32 %v698_v11, %v506_v63  ;;  %v513_v3 = vmul.f32 0.5, %v1889_v20 }
 0x1bc   :  { %v1427_v19 = vpop.eup %1426  ;;  %v699_v14 = vadd.f32 1.0, %v1425_v13  ;;  %v578_v22 = vmul.f32 0.70710677, %v1893_v9  ;;  %v436_v16 = vpop.f32.mrb[56].mxu0  ;;  %v514_v61 = vmul.f32 0.5, %v1893_v9 }
 0x1bd   :  { %v700_v25 = vadd.f32 1.0, %v1427_v19  ;;  %1436 = verf.f32 %v577_v15  ;;  %v1899_v26 = vadd.f32 %v436_v16, %v1647_v5  ;;  %v438_v21 = vpop.f32.mrb[57].mxu0  ;;  %1057 = vmatprep.mubr.f32.mxu1 %v762_v17 }
 0x1be   :  { %1438 = verf.f32 %v578_v22  ;;  %v1903_v23 = vadd.f32 %v438_v21, %v1651_v6  ;;  %1058 = vmatmul.mubr.f32.gmra.mrb[46].mxu1 %v761_v24  ;;  %v763_v39 = vmul.f32 %v699_v14, %v507_v27 }
 0x1bf   :  { %v1429_v29 = vpop.eup %1428  ;;  %v579_v30 = vmul.f32 0.70710677, %v1899_v26  ;;  %v764_v32 = vmul.f32 %v700_v25, %v508_v18 }
 0x1c0   :  { %v1431_v34 = vpop.eup %1430  ;;  %v701_v28 = vadd.f32 1.0, %v1429_v29  ;;  %v580_v37 = vmul.f32 0.70710677, %v1903_v23  ;;  %v442_v31 = vpop.f32.mrb[58].mxu0  ;;  %v516_v9 = vmul.f32 0.5, %v1903_v23 }
 0x1c1   :  { %v702_v41 = vadd.f32 1.0, %v1431_v34  ;;  %1440 = verf.f32 %v579_v30  ;;  %v1909_v35 = vadd.f32 %v442_v31, %v1647_v5  ;;  %v444_v36 = vpop.f32.mrb[59].mxu0  ;;  %1063 = vmatprep.mubr.f32.mxu1 %v764_v32 }
 0x1c2   :  { %1442 = verf.f32 %v580_v37  ;;  %v445_v38 = vadd.f32 %v444_v36, %v1651_v6  ;;  %1064 = vmatmul.mubr.f32.gmra.mrb[48].mxu1 %v763_v39  ;;  %v765_v53 = vmul.f32 %v701_v28, %v509_v42 }
 0x1c3   :  { %v1433_v43 = vpop.eup %1432  ;;  %v581_v44 = vmul.f32 0.70710677, %v1909_v35  ;;  %v766_v46 = vmul.f32 %v702_v41, %v510_v33  ;;  %v517_v29 = vmul.f32 0.5, %v1909_v35 }
 0x1c4   :  { %v1435_v48 = vpop.eup %1434  ;;  %v703_v50 = vadd.f32 1.0, %v1433_v43  ;;  %v582_v40 = vmul.f32 0.70710677, %v445_v38  ;;  %v448_v45 = vpop.f32.mrb[60].mxu0  ;;  %v518_v21 = vmul.f32 0.5, %v445_v38 }
 0x1c5   :  { %v704_v55 = vadd.f32 1.0, %v1435_v48  ;;  %1444 = verf.f32 %v581_v44  ;;  %v449_v49 = vadd.f32 %v448_v45, %v1647_v5  ;;  %v450_v51 = vpop.f32.mrb[61].mxu0  ;;  %1069 = vmatprep.mubr.f32.mxu1 %v766_v46  ;;  %v843_v48 = vld [vmem:[%s2019_s4] sm:$0x3]  ;;  %s1555_s4 = smov [#allocation8]  }
 0x1c6   :  { %1446 = verf.f32 %v582_v40  ;;  %v451_v52 = vadd.f32 %v450_v51, %v1651_v6  ;;  %1070 = vmatmul.mubr.f32.gmra.mrb[50].mxu1 %v765_v53  ;;  %v767_v54 = vmul.f32 %v703_v50, %v511_v56  ;;  %v1930_v50 = vrot.slane %v843_v48, %v194_v2  ;;  %s1181_s8 = sshll.u32 %s1555_s4, 4  ;;  %s1182_s8 = int_to_ptr.vmem [resolvable:$true] %s1181_s8 }
 0x1c7   :  { %v1437_v57 = vpop.eup %1436  ;;  %v583_v58 = vmul.f32 0.70710677, %v449_v49  ;;  %v768_v60 = vmul.f32 %v704_v55, %v512_v47  ;;  %v519_v31 = vmul.f32 0.5, %v449_v49  ;;  %v1934_v40 = vrot.slane %v843_v48, %v198_v4  ;;  %s1522_s9 = scalar_lea.vmem %s1182_s8, 8192  ;;  %p1527_p11 = scmp.lt.s32.totalorder %s1182_s8, %s1182_s8 }
 0x1c8   :  { %v1439_v62 = vpop.eup %1438  ;;  %v705_v0 = vadd.f32 1.0, %v1437_v57  ;;  %v584_v59 = vmul.f32 0.70710677, %v451_v52  ;;  %v454_v8 = vpop.f32.mrb[62].mxu0  ;;  %v520_v37 = vmul.f32 0.5, %v451_v52  ;;  %p1523_p10 = scmp.ne.s32.totalorder %s1182_s8, %s1522_s9  ;;  %p1528_p12 = scmp.lt.s32.totalorder %s1522_s9, %s1522_s9 }
 0x1c9   :  { %v706_v10 = vadd.f32 1.0, %v1439_v62  ;;  %1448 = verf.f32 %v583_v58  ;;  %v455_v63 = vadd.f32 %v454_v8, %v1647_v5  ;;  %v456_v11 = vpop.f32.mrb[63].mxu0  ;;  %1075 = vmatprep.mubr.f32.mxu1 %v768_v60  ;;  %v515_v5 = vmul.f32 0.5, %v1899_v26 }
 0x1ca   :  { %1450 = verf.f32 %v584_v59  ;;  %v457_v7 = vadd.f32 %v456_v11, %v1651_v6  ;;  %1076 = vmatmul.mubr.f32.gmra.mrb[52].mxu1 %v767_v54  ;;  %v769_v22 = vmul.f32 %v705_v0, %v513_v3  ;;  %p1529_p13 = por %p1528_p12, %p1527_p11 }
 0x1cb   :  { %v1441_v12 = vpop.eup %1440  ;;  %v585_v13 = vmul.f32 0.70710677, %v455_v63  ;;  %v770_v15 = vmul.f32 %v706_v10, %v514_v61  ;;  %v521_v35 = vmul.f32 0.5, %v455_v63 }
 0x1cc   :  { %v1443_v17 = vpop.eup %1442  ;;  %v707_v19 = vadd.f32 1.0, %v1441_v12  ;;  %v586_v14 = vmul.f32 0.70710677, %v457_v7  ;;  %v522_v38 = vmul.f32 0.5, %v457_v7  ;;  %p1530_p0 = pnand %p1529_p13, %p1523_p10 }
 0x1cd   :  { %v708_v16 = vadd.f32 1.0, %v1443_v17  ;;  %1452 = verf.f32 %v585_v13  ;;  %1081 = vmatprep.mubr.f32.mxu1 %v770_v15 }
 0x1ce   :  { %1454 = verf.f32 %v586_v14  ;;  %1082 = vmatmul.mubr.f32.gmra.mrb[54].mxu1 %v769_v22  ;;  %v771_v25 = vmul.f32 %v707_v19, %v515_v5 }
 0x1cf   :  { %v1445_v20 = vpop.eup %1444  ;;  %v772_v24 = vmul.f32 %v708_v16, %v516_v9 }
 0x1d0   :  { %v1447_v6 = vpop.eup %1446  ;;  %v709_v18 = vadd.f32 1.0, %v1445_v20 }
 0x1d1   :  { %v710_v27 = vadd.f32 1.0, %v1447_v6  ;;  %1087 = vmatprep.mubr.f32.mxu1 %v772_v24 }
 0x1d2   :  { %1088 = vmatmul.mubr.f32.gmra.mrb[56].mxu1 %v771_v25  ;;  %v773_v28 = vmul.f32 %v709_v18, %v517_v29 }
 0x1d3   :  { %v1449_v30 = vpop.eup %1448  ;;  %v774_v23 = vmul.f32 %v710_v27, %v518_v21 }
 0x1d4   :  { %v1451_v32 = vpop.eup %1450  ;;  %v711_v34 = vadd.f32 1.0, %v1449_v30 }
 0x1d5   :  { %v712_v26 = vadd.f32 1.0, %v1451_v32  ;;  %1093 = vmatprep.mubr.f32.mxu1 %v774_v23 }
 0x1d6   :  { %1094 = vmatmul.mubr.f32.gmra.mrb[58].mxu1 %v773_v28  ;;  %v775_v42 = vmul.f32 %v711_v34, %v519_v31 }
 0x1d7   :  { %v1453_v39 = vpop.eup %1452  ;;  %v776_v33 = vmul.f32 %v712_v26, %v520_v37 }
 0x1d8   :  { %v1455_v41 = vpop.eup %1454  ;;  %v713_v36 = vadd.f32 1.0, %v1453_v39 }
 0x1d9   :  { %v714_v43 = vadd.f32 1.0, %v1455_v41  ;;  %1099 = vmatprep.mubr.f32.mxu1 %v776_v33 }
 0x1da   :  { %1100 = vmatmul.mubr.f32.gmra.mrb[60].mxu1 %v775_v42  ;;  %v777_v46 = vmul.f32 %v713_v36, %v521_v35 }
 0x1db   :  { %v778_v44 = vmul.f32 %v714_v43, %v522_v38 }
 0x1dd   :  { %1105 = vmatprep.mubr.f32.mxu1 %v778_v44 }
 0x1de   :  { %1106 = vmatmul.mubr.f32.gmra.mrb[62].mxu1 %v777_v46 }
 0x235   :  { %v921_v45 = vpop.f32.mrb[0].mxu1 }
 0x236   :  { %v922_v53 = vadd.f32 %v921_v45, %v1930_v50  ;;  %v923_v47 = vpop.f32.mrb[1].mxu1 }
 0x237   :  { %v924_v55 = vadd.f32 %v923_v47, %v1934_v40 }
 0x238   :  { %1112 = vst [vmem:[#allocation8] sm:$0xff] %v922_v53 }
 0x239   :  { %1113 = vst [vmem:[#allocation8 + $0x8] sm:$0xff] %v924_v55  ;;  %v927_v49 = vpop.f32.mrb[2].mxu1 }
 0x23a   :  { %v928_v51 = vadd.f32 %v927_v49, %v1930_v50  ;;  %v929_v56 = vpop.f32.mrb[3].mxu1 }
 0x23b   :  { %v930_v52 = vadd.f32 %v929_v56, %v1934_v40 }
 0x23c   :  { %1114 = vst [vmem:[#allocation8 + $0x10] sm:$0xff] %v928_v51 }
 0x23d   :  { %1115 = vst [vmem:[#allocation8 + $0x18] sm:$0xff] %v930_v52  ;;  %v933_v2 = vpop.f32.mrb[4].mxu1 }
 0x23e   :  { %v934_v1 = vadd.f32 %v933_v2, %v1930_v50  ;;  %v935_v4 = vpop.f32.mrb[5].mxu1 }
 0x23f   :  { %v936_v57 = vadd.f32 %v935_v4, %v1934_v40 }
 0x240   :  { %1116 = vst [vmem:[#allocation8 + $0x20] sm:$0xff] %v934_v1 }
 0x241   :  { %1117 = vst [vmem:[#allocation8 + $0x28] sm:$0xff] %v936_v57  ;;  %v939_v58 = vpop.f32.mrb[6].mxu1 }
 0x242   :  { %v940_v60 = vadd.f32 %v939_v58, %v1930_v50  ;;  %v941_v62 = vpop.f32.mrb[7].mxu1 }
 0x243   :  { %v942_v0 = vadd.f32 %v941_v62, %v1934_v40 }
 0x244   :  { %1118 = vst [vmem:[#allocation8 + $0x30] sm:$0xff] %v940_v60 }
 0x245   :  { %1119 = vst [vmem:[#allocation8 + $0x38] sm:$0xff] %v942_v0  ;;  %v945_v59 = vpop.f32.mrb[8].mxu1 }
 0x246   :  { %v946_v8 = vadd.f32 %v945_v59, %v1930_v50  ;;  %v947_v54 = vpop.f32.mrb[9].mxu1 }
 0x247   :  { %v948_v61 = vadd.f32 %v947_v54, %v1934_v40 }
 0x248   :  { %1120 = vst [vmem:[#allocation8 + $0x40] sm:$0xff] %v946_v8 }
 0x249   :  { %1121 = vst [vmem:[#allocation8 + $0x48] sm:$0xff] %v948_v61  ;;  %v951_v10 = vpop.f32.mrb[10].mxu1 }
 0x24a   :  { %v952_v63 = vadd.f32 %v951_v10, %v1930_v50  ;;  %v953_v11 = vpop.f32.mrb[11].mxu1 }
 0x24b   :  { %v954_v3 = vadd.f32 %v953_v11, %v1934_v40 }
 0x24c   :  { %1122 = vst [vmem:[#allocation8 + $0x50] sm:$0xff] %v952_v63 }
 0x24d   :  { %1123 = vst [vmem:[#allocation8 + $0x58] sm:$0xff] %v954_v3  ;;  %v957_v7 = vpop.f32.mrb[12].mxu1 }
 0x24e   :  { %v958_v12 = vadd.f32 %v957_v7, %v1930_v50  ;;  %v959_v13 = vpop.f32.mrb[13].mxu1 }
 0x24f   :  { %v960_v15 = vadd.f32 %v959_v13, %v1934_v40 }
 0x250   :  { %1124 = vst [vmem:[#allocation8 + $0x60] sm:$0xff] %v958_v12 }
 0x251   :  { %1125 = vst [vmem:[#allocation8 + $0x68] sm:$0xff] %v960_v15  ;;  %v963_v17 = vpop.f32.mrb[14].mxu1 }
 0x252   :  { %v964_v19 = vadd.f32 %v963_v17, %v1930_v50  ;;  %v965_v14 = vpop.f32.mrb[15].mxu1 }
 0x253   :  { %v966_v22 = vadd.f32 %v965_v14, %v1934_v40 }
 0x254   :  { %1126 = vst [vmem:[#allocation8 + $0x70] sm:$0xff] %v964_v19 }
 0x255   :  { %1127 = vst [vmem:[#allocation8 + $0x78] sm:$0xff] %v966_v22  ;;  %v969_v9 = vpop.f32.mrb[16].mxu1 }
 0x256   :  { %v970_v16 = vadd.f32 %v969_v9, %v1930_v50  ;;  %v971_v5 = vpop.f32.mrb[17].mxu1 }
 0x257   :  { %v972_v20 = vadd.f32 %v971_v5, %v1934_v40 }
 0x258   :  { %1128 = vst [vmem:[#allocation8 + $0x80] sm:$0xff] %v970_v16 }
 0x259   :  { %1129 = vst [vmem:[#allocation8 + $0x88] sm:$0xff] %v972_v20  ;;  %v975_v24 = vpop.f32.mrb[18].mxu1 }
 0x25a   :  { %v976_v6 = vadd.f32 %v975_v24, %v1930_v50  ;;  %v977_v18 = vpop.f32.mrb[19].mxu1 }
 0x25b   :  { %v978_v25 = vadd.f32 %v977_v18, %v1934_v40 }
 0x25c   :  { %1130 = vst [vmem:[#allocation8 + $0x90] sm:$0xff] %v976_v6 }
 0x25d   :  { %1131 = vst [vmem:[#allocation8 + $0x98] sm:$0xff] %v978_v25  ;;  %v981_v21 = vpop.f32.mrb[20].mxu1 }
 0x25e   :  { %v982_v27 = vadd.f32 %v981_v21, %v1930_v50  ;;  %v983_v29 = vpop.f32.mrb[21].mxu1 }
 0x25f   :  { %v984_v30 = vadd.f32 %v983_v29, %v1934_v40 }
 0x260   :  { %1132 = vst [vmem:[#allocation8 + $0xa0] sm:$0xff] %v982_v27 }
 0x261   :  { %1133 = vst [vmem:[#allocation8 + $0xa8] sm:$0xff] %v984_v30  ;;  %v987_v23 = vpop.f32.mrb[22].mxu1 }
 0x262   :  { %v988_v32 = vadd.f32 %v987_v23, %v1930_v50  ;;  %v989_v34 = vpop.f32.mrb[23].mxu1 }
 0x263   :  { %v990_v28 = vadd.f32 %v989_v34, %v1934_v40 }
 0x264   :  { %1134 = vst [vmem:[#allocation8 + $0xb0] sm:$0xff] %v988_v32 }
 0x265   :  { %1135 = vst [vmem:[#allocation8 + $0xb8] sm:$0xff] %v990_v28  ;;  %v993_v37 = vpop.f32.mrb[24].mxu1 }
 0x266   :  { %v994_v26 = vadd.f32 %v993_v37, %v1930_v50  ;;  %v995_v31 = vpop.f32.mrb[25].mxu1 }
 0x267   :  { %v996_v39 = vadd.f32 %v995_v31, %v1934_v40 }
 0x268   :  { %1136 = vst [vmem:[#allocation8 + $0xc0] sm:$0xff] %v994_v26 }
 0x269   :  { %1137 = vst [vmem:[#allocation8 + $0xc8] sm:$0xff] %v996_v39  ;;  %v999_v33 = vpop.f32.mrb[26].mxu1 }
 0x26a   :  { %v1000_v41 = vadd.f32 %v999_v33, %v1930_v50  ;;  %v1001_v36 = vpop.f32.mrb[27].mxu1 }
 0x26b   :  { %v1002_v42 = vadd.f32 %v1001_v36, %v1934_v40 }
 0x26c   :  { %1138 = vst [vmem:[#allocation8 + $0xd0] sm:$0xff] %v1000_v41 }
 0x26d   :  { %1139 = vst [vmem:[#allocation8 + $0xd8] sm:$0xff] %v1002_v42  ;;  %v1005_v38 = vpop.f32.mrb[28].mxu1 }
 0x26e   :  { %v1006_v43 = vadd.f32 %v1005_v38, %v1930_v50  ;;  %v1007_v35 = vpop.f32.mrb[29].mxu1 }
 0x26f   :  { %v1008_v44 = vadd.f32 %v1007_v35, %v1934_v40 }
 0x270   :  { %1140 = vst [vmem:[#allocation8 + $0xe0] sm:$0xff] %v1006_v43 }
 0x271   :  { %1141 = vst [vmem:[#allocation8 + $0xe8] sm:$0xff] %v1008_v44  ;;  %v1011_v46 = vpop.f32.mrb[30].mxu1 }
 0x272   :  { %v1012_v48 = vadd.f32 %v1011_v46, %v1930_v50  ;;  %v1013_v45 = vpop.f32.mrb[31].mxu1 }
 0x273   :  { %v1014_v53 = vadd.f32 %v1013_v45, %v1934_v40 }
 0x274   :  { %1142 = vst [vmem:[#allocation8 + $0xf0] sm:$0xff] %v1012_v48 }
 0x275   :  { %1143 = vst [vmem:[#allocation8 + $0xf8] sm:$0xff] %v1014_v53  ;;  %v1017_v47 = vpop.f32.mrb[32].mxu1 }
 0x276   :  { %v1018_v55 = vadd.f32 %v1017_v47, %v1930_v50  ;;  %v1019_v49 = vpop.f32.mrb[33].mxu1 }
 0x277   :  { %v1020_v51 = vadd.f32 %v1019_v49, %v1934_v40 }
 0x278   :  { %1144 = vst [vmem:[#allocation8 + $0x100] sm:$0xff] %v1018_v55 }
 0x279   :  { %1145 = vst [vmem:[#allocation8 + $0x108] sm:$0xff] %v1020_v51  ;;  %v1023_v56 = vpop.f32.mrb[34].mxu1 }
 0x27a   :  { %v1024_v52 = vadd.f32 %v1023_v56, %v1930_v50  ;;  %v1025_v2 = vpop.f32.mrb[35].mxu1 }
 0x27b   :  { %v1026_v1 = vadd.f32 %v1025_v2, %v1934_v40 }
 0x27c   :  { %1146 = vst [vmem:[#allocation8 + $0x110] sm:$0xff] %v1024_v52 }
 0x27d   :  { %1147 = vst [vmem:[#allocation8 + $0x118] sm:$0xff] %v1026_v1  ;;  %v1029_v4 = vpop.f32.mrb[36].mxu1 }
 0x27e   :  { %v1030_v57 = vadd.f32 %v1029_v4, %v1930_v50  ;;  %v1031_v58 = vpop.f32.mrb[37].mxu1 }
 0x27f   :  { %v1032_v60 = vadd.f32 %v1031_v58, %v1934_v40 }
 0x280   :  { %1148 = vst [vmem:[#allocation8 + $0x120] sm:$0xff] %v1030_v57 }
 0x281   :  { %1149 = vst [vmem:[#allocation8 + $0x128] sm:$0xff] %v1032_v60  ;;  %v1035_v62 = vpop.f32.mrb[38].mxu1 }
 0x282   :  { %v1036_v0 = vadd.f32 %v1035_v62, %v1930_v50  ;;  %v1037_v59 = vpop.f32.mrb[39].mxu1 }
 0x283   :  { %v1038_v8 = vadd.f32 %v1037_v59, %v1934_v40 }
 0x284   :  { %1150 = vst [vmem:[#allocation8 + $0x130] sm:$0xff] %v1036_v0 }
 0x285   :  { %1151 = vst [vmem:[#allocation8 + $0x138] sm:$0xff] %v1038_v8  ;;  %v1041_v54 = vpop.f32.mrb[40].mxu1 }
 0x286   :  { %v1042_v61 = vadd.f32 %v1041_v54, %v1930_v50  ;;  %v1043_v10 = vpop.f32.mrb[41].mxu1 }
 0x287   :  { %v1044_v63 = vadd.f32 %v1043_v10, %v1934_v40 }
 0x288   :  { %1152 = vst [vmem:[#allocation8 + $0x140] sm:$0xff] %v1042_v61 }
 0x289   :  { %1153 = vst [vmem:[#allocation8 + $0x148] sm:$0xff] %v1044_v63  ;;  %v1047_v11 = vpop.f32.mrb[42].mxu1 }
 0x28a   :  { %v1048_v3 = vadd.f32 %v1047_v11, %v1930_v50  ;;  %v1049_v7 = vpop.f32.mrb[43].mxu1 }
 0x28b   :  { %v1050_v12 = vadd.f32 %v1049_v7, %v1934_v40 }
 0x28c   :  { %1154 = vst [vmem:[#allocation8 + $0x150] sm:$0xff] %v1048_v3 }
 0x28d   :  { %1155 = vst [vmem:[#allocation8 + $0x158] sm:$0xff] %v1050_v12  ;;  %v1053_v13 = vpop.f32.mrb[44].mxu1 }
 0x28e   :  { %v1054_v15 = vadd.f32 %v1053_v13, %v1930_v50  ;;  %v1055_v17 = vpop.f32.mrb[45].mxu1 }
 0x28f   :  { %v1056_v19 = vadd.f32 %v1055_v17, %v1934_v40 }
 0x290   :  { %1156 = vst [vmem:[#allocation8 + $0x160] sm:$0xff] %v1054_v15 }
 0x291   :  { %1157 = vst [vmem:[#allocation8 + $0x168] sm:$0xff] %v1056_v19  ;;  %v1059_v14 = vpop.f32.mrb[46].mxu1 }
 0x292   :  { %v1060_v22 = vadd.f32 %v1059_v14, %v1930_v50  ;;  %v1061_v9 = vpop.f32.mrb[47].mxu1 }
 0x293   :  { %v1062_v16 = vadd.f32 %v1061_v9, %v1934_v40 }
 0x294   :  { %1158 = vst [vmem:[#allocation8 + $0x170] sm:$0xff] %v1060_v22 }
 0x295   :  { %1159 = vst [vmem:[#allocation8 + $0x178] sm:$0xff] %v1062_v16  ;;  %v1065_v5 = vpop.f32.mrb[48].mxu1 }
 0x296   :  { %v1066_v20 = vadd.f32 %v1065_v5, %v1930_v50  ;;  %v1067_v24 = vpop.f32.mrb[49].mxu1 }
 0x297   :  { %v1068_v6 = vadd.f32 %v1067_v24, %v1934_v40 }
 0x298   :  { %1160 = vst [vmem:[#allocation8 + $0x180] sm:$0xff] %v1066_v20 }
 0x299   :  { %1161 = vst [vmem:[#allocation8 + $0x188] sm:$0xff] %v1068_v6  ;;  %v1071_v18 = vpop.f32.mrb[50].mxu1 }
 0x29a   :  { %v1072_v25 = vadd.f32 %v1071_v18, %v1930_v50  ;;  %v1073_v21 = vpop.f32.mrb[51].mxu1 }
 0x29b   :  { %v1074_v27 = vadd.f32 %v1073_v21, %v1934_v40 }
 0x29c   :  { %1162 = vst [vmem:[#allocation8 + $0x190] sm:$0xff] %v1072_v25 }
 0x29d   :  { %1163 = vst [vmem:[#allocation8 + $0x198] sm:$0xff] %v1074_v27  ;;  %v1077_v29 = vpop.f32.mrb[52].mxu1 }
 0x29e   :  { %v1078_v30 = vadd.f32 %v1077_v29, %v1930_v50  ;;  %v1079_v23 = vpop.f32.mrb[53].mxu1 }
 0x29f   :  { %v1080_v32 = vadd.f32 %v1079_v23, %v1934_v40 }
 0x2a0   :  { %1164 = vst [vmem:[#allocation8 + $0x1a0] sm:$0xff] %v1078_v30 }
 0x2a1   :  { %1165 = vst [vmem:[#allocation8 + $0x1a8] sm:$0xff] %v1080_v32  ;;  %v1083_v34 = vpop.f32.mrb[54].mxu1 }
 0x2a2   :  { %v1084_v28 = vadd.f32 %v1083_v34, %v1930_v50  ;;  %v1085_v37 = vpop.f32.mrb[55].mxu1 }
 0x2a3   :  { %v1086_v26 = vadd.f32 %v1085_v37, %v1934_v40 }
 0x2a4   :  { %1166 = vst [vmem:[#allocation8 + $0x1b0] sm:$0xff] %v1084_v28 }
 0x2a5   :  { %1167 = vst [vmem:[#allocation8 + $0x1b8] sm:$0xff] %v1086_v26  ;;  %v1089_v31 = vpop.f32.mrb[56].mxu1 }
 0x2a6   :  { %v1090_v39 = vadd.f32 %v1089_v31, %v1930_v50  ;;  %v1091_v33 = vpop.f32.mrb[57].mxu1 }
 0x2a7   :  { %v1092_v41 = vadd.f32 %v1091_v33, %v1934_v40 }
 0x2a8   :  { %1168 = vst [vmem:[#allocation8 + $0x1c0] sm:$0xff] %v1090_v39 }
 0x2a9   :  { %1169 = vst [vmem:[#allocation8 + $0x1c8] sm:$0xff] %v1092_v41  ;;  %v1095_v36 = vpop.f32.mrb[58].mxu1 }
 0x2aa   :  { %v1096_v42 = vadd.f32 %v1095_v36, %v1930_v50  ;;  %v1097_v38 = vpop.f32.mrb[59].mxu1 }
 0x2ab   :  { %v1098_v43 = vadd.f32 %v1097_v38, %v1934_v40 }
 0x2ac   :  { %1170 = vst [vmem:[#allocation8 + $0x1d0] sm:$0xff] %v1096_v42 }
 0x2ad   :  { %1171 = vst [vmem:[#allocation8 + $0x1d8] sm:$0xff] %v1098_v43  ;;  %v1101_v35 = vpop.f32.mrb[60].mxu1 }
 0x2ae   :  { %v1102_v44 = vadd.f32 %v1101_v35, %v1930_v50  ;;  %v1103_v46 = vpop.f32.mrb[61].mxu1 }
 0x2af   :  { %v1104_v48 = vadd.f32 %v1103_v46, %v1934_v40 }
 0x2b0   :  { %1172 = vst [vmem:[#allocation8 + $0x1e0] sm:$0xff] %v1102_v44 }
 0x2b1   :  { %1173 = vst [vmem:[#allocation8 + $0x1e8] sm:$0xff] %v1104_v48  ;;  %v1107_v45 = vpop.f32.mrb[62].mxu1 }
 0x2b2   :  { %v1108_v53 = vadd.f32 %v1107_v45, %v1930_v50  ;;  %v1109_v47 = vpop.f32.mrb[63].mxu1 }
 0x2b3   :  { %v1110_v55 = vadd.f32 %v1109_v47, %v1934_v40 }
 0x2b4   :  { %1174 = vst [vmem:[#allocation8 + $0x1f0] sm:$0xff] %v1108_v53 }
 0x2b5   :  { %1175 = vst [vmem:[#allocation8 + $0x1f8] sm:$0xff] %v1110_v55 }
 0x2b6   :  { %1533 = shalt.err (!%p1530_p0)
}
 0x2b7   :  { %s1534_s12 = scalar_lea.hbm %s2020_s5, 8192 }
 0x2b8   :  { %p1535_p1 = scmp.ne.s32.totalorder %s2020_s5, %s1534_s12  ;;  %p1538_p2 = scmp.lt.u32.totalorder %s1534_s12, %s2020_s5 }
 0x2ba   :  { %p1540_p3 = pnand %p1538_p2, %p1535_p1 }
 0x2bc   :  { %1543 = shalt.err (!%p1540_p3)
}
 0x2bd   :  { %1187 = dma.vmem_to_hbm [thread:$0]  %s1182_s8, 8192, %s2020_s5, [#allocation4], %s1552_s30, %s1552_s30, %s1553_s6  }
 0x2be   :  { %1548 = dma.done.wait [#allocation4], 8192  }
 0x2bf   :  { %1549 = vsyncadd [#allocation4], 4294959104 }
 0x2c0   :  { %1191 = vsyncpa [#allocation3], 1 }
 0x2c1   :  { %1192 = vsyncpa [#allocation6], 1 }
 0x2c2   :  { %1193 = vsyncpa [#allocation4], 1 }

</bundles_post_ra>
